<compile_context>
chip_gen: v6e
topology: v6e:2x2x1
jax: 0.10.0
libtpu: 0.0.40
codegen_flags: <defaults>
</compile_context>

<pallas_src>
import functools

import jax
import jax.numpy as jnp
from jax import lax
from jax.experimental import pallas as pl
from jax.experimental.pallas import tpu as pltpu


def _round_up(x, m):
    return (x + m - 1) // m * m


# ------------------------------ fused kernel --------------------------------

def _vit_kernel(
    xp_ref,    # (N, Cpp)      this image's patchified pixels
    pw_ref,    # (Cpp, D)      patch-embedding weight
    pos_ref,   # (Sp, D)       positional embedding, zero rows S..Sp
    vec_ref,   # (8, D) rows:  patch_b, cls, ln1_a, ln1_b, ln2_a, ln2_b,
               #               cls_ln_g, cls_ln_b
    wqkv_ref,  # (D, 3D)       fused Q|K|V weight
    bqkv_ref,  # (1, 3D)
    wo_ref,    # (D, D)
    bo_ref,    # (1, D)
    w1_ref,    # (D, 4D)
    b1_ref,    # (1, 4D)
    w2_ref,    # (4D, D)
    b2_ref,    # (1, D)
    wc_ref,    # (D, NCLS_PAD) classifier weight (lane-padded)
    bc_ref,    # (1, NCLS_PAD)
    o_ref,     # (1, 1, NCLS_PAD) logits for this image
    *, S, Sp, D, H, depth,
):
    dh = D // H
    scale = 1.0 / (float(dh) ** 0.5)

    patch_b = vec_ref[0:1, :]
    cls_vec = vec_ref[1:2, :]
    ln1_a, ln1_b = vec_ref[2:3, :], vec_ref[3:4, :]
    ln2_a, ln2_b = vec_ref[4:5, :], vec_ref[5:6, :]
    cls_g, cls_b = vec_ref[6:7, :], vec_ref[7:8, :]

    # --- prologue: patch embed + cls token + positional embedding -----------
    tok = (
        jnp.dot(xp_ref[...], pw_ref[...], preferred_element_type=jnp.float32)
        + patch_b
    )                                                     # (N, D)
    pieces = [cls_vec, tok]
    if Sp > S:
        pieces.append(jnp.zeros((Sp - S, D), jnp.float32))
    x = jnp.concatenate(pieces, axis=0) + pos_ref[...]    # (Sp, D); pad rows 0

    # key-padding mask: padded key columns (>= S) are excluded from softmax
    key_mask = lax.broadcasted_iota(jnp.int32, (Sp, Sp), 1) < S

    def custom_ln(v, a, b):
        # torch-style: a*(x-mean)/(std+eps)+b with unbiased std (ddof=1)
        mean = jnp.mean(v, axis=-1, keepdims=True)
        var = jnp.sum((v - mean) ** 2, axis=-1, keepdims=True) / (D - 1)
        return a * (v - mean) / (jnp.sqrt(var) + 1e-6) + b

    # --- depth x encoder layer (clones() -> identical shared weights) -------
    def layer(_, x):
        # sublayer 0: x + MHA(LN(x))
        xn = custom_ln(x, ln1_a, ln1_b)
        qkv = (
            jnp.dot(xn, wqkv_ref[...], preferred_element_type=jnp.float32)
            + bqkv_ref[...]
        )                                                 # (Sp, 3D)
        qh = qkv[:, 0:D].reshape(Sp, H, dh).transpose(1, 0, 2)        # (H,Sp,dh)
        kh = qkv[:, D:2 * D].reshape(Sp, H, dh).transpose(1, 0, 2)
        vh = qkv[:, 2 * D:3 * D].reshape(Sp, H, dh).transpose(1, 0, 2)

        sc = jnp.einsum("hqd,hkd->hqk", qh, kh,
                        preferred_element_type=jnp.float32) * scale   # (H,Sp,Sp)
        sc = jnp.where(key_mask, sc, -1e30)
        sc = sc - jnp.max(sc, axis=-1, keepdims=True)
        p = jnp.exp(sc)
        p = p * pl.reciprocal(jnp.sum(p, axis=-1, keepdims=True), approx=True)

        ctx = jnp.einsum("hqk,hkd->hqd", p, vh,
                         preferred_element_type=jnp.float32)          # (H,Sp,dh)
        ctx = ctx.transpose(1, 0, 2).reshape(Sp, D)
        attn = (
            jnp.dot(ctx, wo_ref[...], preferred_element_type=jnp.float32)
            + bo_ref[...]
        )                                                 # ONE full-K projection
        x = x + attn                                      # dropout = identity

        # sublayer 1: x + FFN(LN(x))
        xn2 = custom_ln(x, ln2_a, ln2_b)
        hid = (
            jnp.dot(xn2, w1_ref[...], preferred_element_type=jnp.float32)
            + b1_ref[...]
        )
        hid = 0.5 * hid * (1.0 + lax.erf(hid * 0.7071067811865476))  # exact GELU
        x = x + (
            jnp.dot(hid, w2_ref[...], preferred_element_type=jnp.float32)
            + b2_ref[...]
        )
        return x

    x = lax.fori_loop(0, depth, layer, x)

    # --- classification head on the cls row (token 0) -----------------------
    cls_row = x[0:1, :]
    mean = jnp.mean(cls_row, axis=-1, keepdims=True)
    var = jnp.mean((cls_row - mean) ** 2, axis=-1, keepdims=True)
    xn = (cls_row - mean) * lax.rsqrt(var + 1e-5) * cls_g + cls_b
    logits = (
        jnp.dot(xn, wc_ref[...], preferred_element_type=jnp.float32)
        + bc_ref[...]
    )                                                     # (1, NCLS_PAD)
    o_ref[...] = logits[None]                             # (1, 1, NCLS_PAD)


# -------------------------------- wrapper ------------------------------------

def vit_forward(x_img, params, *, patch, num_heads, depth):
    B, C, Himg, Wimg = x_img.shape
    hp, wp = Himg // patch, Wimg // patch
    N = hp * wp
    S = N + 1
    Sp = _round_up(S, 8)                 # sublane-aligned sequence length
    Cpp = C * patch * patch
    D = params["patch_w"].shape[1]
    NCLS = params["wc"].shape[1]
    NCLS_PAD = _round_up(max(NCLS, 128), 128)   # lane-dense logits

    # patchify (pure layout; feature order (C, ph, pw) matches a flattened
    # Conv2d(patch, stride=patch) weight)
    xp = x_img.reshape(B, C, hp, patch, wp, patch)
    xp = xp.transpose(0, 2, 4, 1, 3, 5).reshape(B * N, Cpp)

    pos = params["pos"].reshape(S, D)
    pos_pad = jnp.zeros((Sp, D), jnp.float32).at[:S].set(pos)

    vec = jnp.stack([
        params["patch_b"].reshape(-1),
        params["cls"].reshape(-1),
        params["ln1_a"].reshape(-1), params["ln1_b"].reshape(-1),
        params["ln2_a"].reshape(-1), params["ln2_b"].reshape(-1),
        params["cls_ln_g"].reshape(-1), params["cls_ln_b"].reshape(-1),
    ], axis=0)                                            # (8, D)

    wqkv = jnp.concatenate([params["wq"], params["wk"], params["wv"]], axis=1)
    bqkv = jnp.concatenate(
        [params["bq"], params["bk"], params["bv"]]).reshape(1, 3 * D)
    bo = params["bo"].reshape(1, D)
    b1 = params["b1"].reshape(1, 4 * D)
    b2 = params["b2"].reshape(1, D)
    wc_pad = jnp.zeros((D, NCLS_PAD), jnp.float32).at[:, :NCLS].set(params["wc"])
    bc_pad = jnp.zeros((1, NCLS_PAD), jnp.float32).at[0, :NCLS].set(params["bc"])

    kernel = functools.partial(
        _vit_kernel, S=S, Sp=Sp, D=D, H=num_heads, depth=depth)

    def fullspec(shape):
        return pl.BlockSpec(shape, lambda b: (0,) * len(shape))

    out = pl.pallas_call(
        kernel,
        out_shape=jax.ShapeDtypeStruct((B, 1, NCLS_PAD), jnp.float32),
        grid=(B,),
        in_specs=[
            pl.BlockSpec((N, Cpp), lambda b: (b, 0)),     # per-image patches
            fullspec((Cpp, D)),                           # patch weight
            fullspec((Sp, D)),                            # pos (padded)
            fullspec((8, D)),                             # vector params
            fullspec((D, 3 * D)),                         # wqkv
            fullspec((1, 3 * D)),                         # bqkv
            fullspec((D, D)),                             # wo
            fullspec((1, D)),                             # bo
            fullspec((D, 4 * D)),                         # w1
            fullspec((1, 4 * D)),                         # b1
            fullspec((4 * D, D)),                         # w2
            fullspec((1, D)),                             # b2
            fullspec((D, NCLS_PAD)),                      # wc (lane-padded)
            fullspec((1, NCLS_PAD)),                      # bc (lane-padded)
        ],
        out_specs=pl.BlockSpec((1, 1, NCLS_PAD), lambda b: (b, 0, 0)),
        compiler_params=pltpu.CompilerParams(
            dimension_semantics=("parallel",)),           # v7x: use both TCs
    )(xp, params["patch_w"], pos_pad, vec, wqkv, bqkv,
      params["wo"], bo, params["w1"], b1, params["w2"], b2, wc_pad, bc_pad)

    return out[:, 0, :NCLS]


# ---------------------------------- main --------------------------------------

if __name__ == "__main__":
    # Small shapes consistent with the module's forward
    B, C, IMG, P = 2, 3, 16, 4        # -> N = (16/4)^2 = 16 patches, S = 17
    D, HEADS, DEPTH, NCLS = 32, 4, 2, 2
    N = (IMG // P) ** 2

    key = jax.random.PRNGKey(0)
    ks = jax.random.split(key, 24)

    def nrm(k, shape):
        return jax.random.normal(k, shape, dtype=jnp.float32) * 0.02

    params = {
        "patch_w": nrm(ks[0], (C * P * P, D)),
        "patch_b": nrm(ks[1], (D,)),
        "cls": nrm(ks[2], (1, 1, D)),
        "pos": nrm(ks[3], (1, N + 1, D)),
        # one encoder layer's weights, shared across depth (deepcopy semantics)
        "wq": nrm(ks[4], (D, D)), "bq": nrm(ks[5], (D,)),
        "wk": nrm(ks[6], (D, D)), "bk": nrm(ks[7], (D,)),
        "wv": nrm(ks[8], (D, D)), "bv": nrm(ks[9], (D,)),
        "wo": nrm(ks[10], (D, D)), "bo": nrm(ks[11], (D,)),
        "ln1_a": jnp.ones((D,), jnp.float32), "ln1_b": jnp.zeros((D,), jnp.float32),
        "w1": nrm(ks[12], (D, 4 * D)), "b1": nrm(ks[13], (4 * D,)),
        "w2": nrm(ks[14], (4 * D, D)), "b2": nrm(ks[15], (D,)),
        "ln2_a": jnp.ones((D,), jnp.float32), "ln2_b": jnp.zeros((D,), jnp.float32),
        # classification head
        "cls_ln_g": jnp.ones((D,), jnp.float32),
        "cls_ln_b": jnp.zeros((D,), jnp.float32),
        "wc": nrm(ks[16], (D, NCLS)), "bc": nrm(ks[17], (NCLS,)),
    }

    x_img = jax.random.normal(ks[18], (B, C, IMG, IMG), dtype=jnp.float32)

    fwd = jax.jit(
        functools.partial(vit_forward, patch=P, num_heads=HEADS, depth=DEPTH)
    )
    out = fwd(x_img, params)
    jax.block_until_ready(out)
    assert out.shape == (B, NCLS) and out.dtype == jnp.float32
    assert bool(jnp.all(jnp.isfinite(out)))
    print("KERNEL_OK")
</pallas_src>

<mosaic_0001>
module attributes {stable_mosaic.version = 11 : i64} {
  func.func @_vit_kernel(%arg0: i32, %arg1: memref<16x48xf32, #tpu.memory_space<vmem>>, %arg2: memref<48x32xf32, #tpu.memory_space<vmem>>, %arg3: memref<24x32xf32, #tpu.memory_space<vmem>>, %arg4: memref<8x32xf32, #tpu.memory_space<vmem>>, %arg5: memref<32x96xf32, #tpu.memory_space<vmem>>, %arg6: memref<1x96xf32, #tpu.memory_space<vmem>>, %arg7: memref<32x32xf32, #tpu.memory_space<vmem>>, %arg8: memref<1x32xf32, #tpu.memory_space<vmem>>, %arg9: memref<32x128xf32, #tpu.memory_space<vmem>>, %arg10: memref<1x128xf32, #tpu.memory_space<vmem>>, %arg11: memref<128x32xf32, #tpu.memory_space<vmem>>, %arg12: memref<1x32xf32, #tpu.memory_space<vmem>>, %arg13: memref<32x128xf32, #tpu.memory_space<vmem>>, %arg14: memref<1x128xf32, #tpu.memory_space<vmem>>, %arg15: memref<1x1x128xf32, #tpu.memory_space<vmem>>) attributes {dimension_semantics = [#tpu.dimension_semantics<parallel>], iteration_bounds = array<i64: 2>, scalar_prefetch = 0 : i64, scratch_operands = 0 : i64, tpu.core_type = #tpu.core_type<tc>, window_params = [{transform_indices = @transform_0, window_bounds = array<i64: 16, 48>}, {pipeline_mode = #tpu.pipeline_mode<synchronous>, transform_indices = @transform_1, window_bounds = array<i64: 48, 32>}, {pipeline_mode = #tpu.pipeline_mode<synchronous>, transform_indices = @transform_2, window_bounds = array<i64: 24, 32>}, {pipeline_mode = #tpu.pipeline_mode<synchronous>, transform_indices = @transform_3, window_bounds = array<i64: 8, 32>}, {pipeline_mode = #tpu.pipeline_mode<synchronous>, transform_indices = @transform_4, window_bounds = array<i64: 32, 96>}, {pipeline_mode = #tpu.pipeline_mode<synchronous>, transform_indices = @transform_5, window_bounds = array<i64: 1, 96>}, {pipeline_mode = #tpu.pipeline_mode<synchronous>, transform_indices = @transform_6, window_bounds = array<i64: 32, 32>}, {pipeline_mode = #tpu.pipeline_mode<synchronous>, transform_indices = @transform_7, window_bounds = array<i64: 1, 32>}, {pipeline_mode = #tpu.pipeline_mode<synchronous>, transform_indices = @transform_8, window_bounds = array<i64: 32, 128>}, {pipeline_mode = #tpu.pipeline_mode<synchronous>, transform_indices = @transform_9, window_bounds = array<i64: 1, 128>}, {pipeline_mode = #tpu.pipeline_mode<synchronous>, transform_indices = @transform_10, window_bounds = array<i64: 128, 32>}, {pipeline_mode = #tpu.pipeline_mode<synchronous>, transform_indices = @transform_11, window_bounds = array<i64: 1, 32>}, {pipeline_mode = #tpu.pipeline_mode<synchronous>, transform_indices = @transform_12, window_bounds = array<i64: 32, 128>}, {pipeline_mode = #tpu.pipeline_mode<synchronous>, transform_indices = @transform_13, window_bounds = array<i64: 1, 128>}, {transform_indices = @transform_14, window_bounds = array<i64: 1, 1, 128>}]} {
    %c0 = arith.constant 0 : index
    %c0_0 = arith.constant 0 : index
    %0 = vector.load %arg4[%c0, %c0_0] : memref<8x32xf32, #tpu.memory_space<vmem>>, vector<1x32xf32>
    %c1 = arith.constant 1 : index
    %c0_1 = arith.constant 0 : index
    %1 = vector.load %arg4[%c1, %c0_1] : memref<8x32xf32, #tpu.memory_space<vmem>>, vector<1x32xf32>
    %c2 = arith.constant 2 : index
    %c0_2 = arith.constant 0 : index
    %2 = vector.load %arg4[%c2, %c0_2] : memref<8x32xf32, #tpu.memory_space<vmem>>, vector<1x32xf32>
    %c3 = arith.constant 3 : index
    %c0_3 = arith.constant 0 : index
    %3 = vector.load %arg4[%c3, %c0_3] : memref<8x32xf32, #tpu.memory_space<vmem>>, vector<1x32xf32>
    %c4 = arith.constant 4 : index
    %c0_4 = arith.constant 0 : index
    %4 = vector.load %arg4[%c4, %c0_4] : memref<8x32xf32, #tpu.memory_space<vmem>>, vector<1x32xf32>
    %c5 = arith.constant 5 : index
    %c0_5 = arith.constant 0 : index
    %5 = vector.load %arg4[%c5, %c0_5] : memref<8x32xf32, #tpu.memory_space<vmem>>, vector<1x32xf32>
    %c6 = arith.constant 6 : index
    %c0_6 = arith.constant 0 : index
    %6 = vector.load %arg4[%c6, %c0_6] : memref<8x32xf32, #tpu.memory_space<vmem>>, vector<1x32xf32>
    %c7 = arith.constant 7 : index
    %c0_7 = arith.constant 0 : index
    %7 = vector.load %arg4[%c7, %c0_7] : memref<8x32xf32, #tpu.memory_space<vmem>>, vector<1x32xf32>
    %c0_8 = arith.constant 0 : index
    %c0_9 = arith.constant 0 : index
    %8 = vector.load %arg1[%c0_8, %c0_9] : memref<16x48xf32, #tpu.memory_space<vmem>>, vector<16x48xf32>
    %c0_10 = arith.constant 0 : index
    %c0_11 = arith.constant 0 : index
    %9 = vector.load %arg2[%c0_10, %c0_11] : memref<48x32xf32, #tpu.memory_space<vmem>>, vector<48x32xf32>
    %cst = arith.constant dense<0.000000e+00> : vector<16x32xf32>
    %10 = tpu.matmul %8, %9, %cst {dimension_numbers = #tpu.dot_dimension_numbers<[1], [0], [0], [1], [0, 0, 1, 1], [], []>} : vector<16x48xf32>, vector<48x32xf32>, vector<16x32xf32> -> vector<16x32xf32>
    %11 = vector.broadcast %0 : vector<1x32xf32> to vector<16x32xf32>
    %12 = arith.addf %10, %11 : vector<16x32xf32>
    %cst_12 = arith.constant 0.000000e+00 : f32
    %13 = vector.broadcast %cst_12 : f32 to vector<7x32xf32>
    %14 = tpu.concatenate %1, %12, %13 in 0 : vector<1x32xf32>, vector<16x32xf32>, vector<7x32xf32> -> vector<24x32xf32>
    %c0_13 = arith.constant 0 : index
    %c0_14 = arith.constant 0 : index
    %15 = vector.load %arg3[%c0_13, %c0_14] : memref<24x32xf32, #tpu.memory_space<vmem>>, vector<24x32xf32>
    %16 = arith.addf %14, %15 : vector<24x32xf32>
    %17 = tpu.iota {dimensions = array<i32: 1>} : vector<24x24xi32>
    %c17_i32 = arith.constant 17 : i32
    %18 = vector.broadcast %c17_i32 : i32 to vector<24x24xi32>
    %19 = arith.cmpi slt, %17, %18 : vector<24x24xi32>
    %c0_i32 = arith.constant 0 : i32
    %c2_i32 = arith.constant 2 : i32
    %20 = arith.addi %c0_i32, %c2_i32 : i32
    %c1_i32 = arith.constant 1 : i32
    %21 = scf.for %arg16 = %c0_i32 to %20 step %c1_i32 iter_args(%arg17 = %16) -> (vector<24x32xf32>)  : i32 {
      %cst_28 = arith.constant dense<0.000000e+00> : vector<24xf32>
      %49 = vector.multi_reduction <add>, %arg17, %cst_28 [1] : vector<24x32xf32> to vector<24xf32>
      %50 = vector.shape_cast %49 : vector<24xf32> to vector<24x1xf32>
      %cst_29 = arith.constant 3.200000e+01 : f32
      %51 = vector.broadcast %cst_29 : f32 to vector<24x1xf32>
      %52 = arith.divf %50, %51 : vector<24x1xf32>
      %53 = vector.broadcast %52 : vector<24x1xf32> to vector<24x32xf32>
      %54 = arith.subf %arg17, %53 : vector<24x32xf32>
      %55 = arith.mulf %54, %54 : vector<24x32xf32>
      %cst_30 = arith.constant dense<0.000000e+00> : vector<24xf32>
      %56 = vector.multi_reduction <add>, %55, %cst_30 [1] : vector<24x32xf32> to vector<24xf32>
      %57 = vector.shape_cast %56 : vector<24xf32> to vector<24x1xf32>
      %cst_31 = arith.constant 3.100000e+01 : f32
      %58 = vector.broadcast %cst_31 : f32 to vector<24x1xf32>
      %59 = arith.divf %57, %58 : vector<24x1xf32>
      %60 = vector.broadcast %52 : vector<24x1xf32> to vector<24x32xf32>
      %61 = arith.subf %arg17, %60 : vector<24x32xf32>
      %62 = vector.broadcast %2 : vector<1x32xf32> to vector<24x32xf32>
      %63 = arith.mulf %62, %61 : vector<24x32xf32>
      %64 = math.sqrt %59 : vector<24x1xf32>
      %cst_32 = arith.constant 9.99999997E-7 : f32
      %65 = vector.broadcast %cst_32 : f32 to vector<24x1xf32>
      %66 = arith.addf %64, %65 : vector<24x1xf32>
      %67 = vector.broadcast %66 : vector<24x1xf32> to vector<24x32xf32>
      %68 = arith.divf %63, %67 : vector<24x32xf32>
      %69 = vector.broadcast %3 : vector<1x32xf32> to vector<24x32xf32>
      %70 = arith.addf %68, %69 : vector<24x32xf32>
      %c0_33 = arith.constant 0 : index
      %c0_34 = arith.constant 0 : index
      %71 = vector.load %arg5[%c0_33, %c0_34] : memref<32x96xf32, #tpu.memory_space<vmem>>, vector<32x96xf32>
      %cst_35 = arith.constant dense<0.000000e+00> : vector<24x96xf32>
      %72 = tpu.matmul %70, %71, %cst_35 {dimension_numbers = #tpu.dot_dimension_numbers<[1], [0], [0], [1], [0, 0, 1, 1], [], []>} : vector<24x32xf32>, vector<32x96xf32>, vector<24x96xf32> -> vector<24x96xf32>
      %c0_36 = arith.constant 0 : index
      %c0_37 = arith.constant 0 : index
      %73 = vector.load %arg6[%c0_36, %c0_37] : memref<1x96xf32, #tpu.memory_space<vmem>>, vector<1x96xf32>
      %74 = vector.broadcast %73 : vector<1x96xf32> to vector<24x96xf32>
      %75 = arith.addf %72, %74 : vector<24x96xf32>
      %76 = vector.extract_strided_slice %75 {offsets = [0, 0], sizes = [24, 32], strides = [1, 1]} : vector<24x96xf32> to vector<24x32xf32>
      %77 = vector.shape_cast %76 : vector<24x32xf32> to vector<24x4x8xf32>
      %78 = tpu.transpose %77, [1, 0, 2] : vector<24x4x8xf32> -> vector<4x24x8xf32>
      %79 = vector.extract_strided_slice %75 {offsets = [0, 32], sizes = [24, 32], strides = [1, 1]} : vector<24x96xf32> to vector<24x32xf32>
      %80 = vector.shape_cast %79 : vector<24x32xf32> to vector<24x4x8xf32>
      %81 = tpu.transpose %80, [1, 0, 2] : vector<24x4x8xf32> -> vector<4x24x8xf32>
      %82 = vector.extract_strided_slice %75 {offsets = [0, 64], sizes = [24, 32], strides = [1, 1]} : vector<24x96xf32> to vector<24x32xf32>
      %83 = vector.shape_cast %82 : vector<24x32xf32> to vector<24x4x8xf32>
      %84 = tpu.transpose %83, [1, 0, 2] : vector<24x4x8xf32> -> vector<4x24x8xf32>
      "tpu.trace_start"() <{level = 10 : i32, message = "hqd,hkd->hqk"}> : () -> ()
      %cst_38 = arith.constant dense<0.000000e+00> : vector<4x24x24xf32>
      %85 = tpu.matmul %78, %81, %cst_38 {dimension_numbers = #tpu.dot_dimension_numbers<[2], [2], [1], [1], [0, 0, 0, 1, 1, 1], [0], [0]>} : vector<4x24x8xf32>, vector<4x24x8xf32>, vector<4x24x24xf32> -> vector<4x24x24xf32>
      "tpu.trace_stop"() : () -> ()
      %cst_39 = arith.constant 0.353553385 : f32
      %86 = vector.broadcast %cst_39 : f32 to vector<4x24x24xf32>
      %87 = arith.mulf %85, %86 : vector<4x24x24xf32>
      %cst_40 = arith.constant -1.000000e+30 : f32
      %88 = vector.shape_cast %19 : vector<24x24xi1> to vector<1x24x24xi1>
      %89 = vector.broadcast %88 : vector<1x24x24xi1> to vector<4x24x24xi1>
      %90 = vector.broadcast %cst_40 : f32 to vector<4x24x24xf32>
      %91 = arith.select %89, %87, %90 : vector<4x24x24xi1>, vector<4x24x24xf32>
      %cst_41 = arith.constant dense<0xFF800000> : vector<4x24xf32>
      %92 = vector.multi_reduction <maximumf>, %91, %cst_41 [2] : vector<4x24x24xf32> to vector<4x24xf32>
      %93 = vector.shape_cast %92 : vector<4x24xf32> to vector<4x24x1xf32>
      %94 = vector.broadcast %93 : vector<4x24x1xf32> to vector<4x24x24xf32>
      %95 = arith.subf %91, %94 : vector<4x24x24xf32>
      %96 = math.exp %95 : vector<4x24x24xf32>
      %cst_42 = arith.constant dense<0.000000e+00> : vector<4x24xf32>
      %97 = vector.multi_reduction <add>, %96, %cst_42 [2] : vector<4x24x24xf32> to vector<4x24xf32>
      %98 = vector.shape_cast %97 : vector<4x24xf32> to vector<4x24x1xf32>
      %99 = tpu.reciprocal %98 {approx = true} : vector<4x24x1xf32> -> vector<4x24x1xf32>
      %100 = vector.broadcast %99 : vector<4x24x1xf32> to vector<4x24x24xf32>
      %101 = arith.mulf %96, %100 : vector<4x24x24xf32>
      "tpu.trace_start"() <{level = 10 : i32, message = "hqk,hkd->hqd"}> : () -> ()
      %cst_43 = arith.constant dense<0.000000e+00> : vector<4x24x8xf32>
      %102 = tpu.matmul %101, %84, %cst_43 {dimension_numbers = #tpu.dot_dimension_numbers<[2], [1], [1], [2], [0, 0, 0, 1, 1, 2], [0], [0]>} : vector<4x24x24xf32>, vector<4x24x8xf32>, vector<4x24x8xf32> -> vector<4x24x8xf32>
      "tpu.trace_stop"() : () -> ()
      %103 = tpu.transpose %102, [1, 0, 2] : vector<4x24x8xf32> -> vector<24x4x8xf32>
      %104 = vector.shape_cast %103 : vector<24x4x8xf32> to vector<24x32xf32>
      %c0_44 = arith.constant 0 : index
      %c0_45 = arith.constant 0 : index
      %105 = vector.load %arg7[%c0_44, %c0_45] : memref<32x32xf32, #tpu.memory_space<vmem>>, vector<32x32xf32>
      %cst_46 = arith.constant dense<0.000000e+00> : vector<24x32xf32>
      %106 = tpu.matmul %104, %105, %cst_46 {dimension_numbers = #tpu.dot_dimension_numbers<[1], [0], [0], [1], [0, 0, 1, 1], [], []>} : vector<24x32xf32>, vector<32x32xf32>, vector<24x32xf32> -> vector<24x32xf32>
      %c0_47 = arith.constant 0 : index
      %c0_48 = arith.constant 0 : index
      %107 = vector.load %arg8[%c0_47, %c0_48] : memref<1x32xf32, #tpu.memory_space<vmem>>, vector<1x32xf32>
      %108 = vector.broadcast %107 : vector<1x32xf32> to vector<24x32xf32>
      %109 = arith.addf %106, %108 : vector<24x32xf32>
      %110 = arith.addf %arg17, %109 : vector<24x32xf32>
      %cst_49 = arith.constant dense<0.000000e+00> : vector<24xf32>
      %111 = vector.multi_reduction <add>, %110, %cst_49 [1] : vector<24x32xf32> to vector<24xf32>
      %112 = vector.shape_cast %111 : vector<24xf32> to vector<24x1xf32>
      %cst_50 = arith.constant 3.200000e+01 : f32
      %113 = vector.broadcast %cst_50 : f32 to vector<24x1xf32>
      %114 = arith.divf %112, %113 : vector<24x1xf32>
      %115 = vector.broadcast %114 : vector<24x1xf32> to vector<24x32xf32>
      %116 = arith.subf %110, %115 : vector<24x32xf32>
      %117 = arith.mulf %116, %116 : vector<24x32xf32>
      %cst_51 = arith.constant dense<0.000000e+00> : vector<24xf32>
      %118 = vector.multi_reduction <add>, %117, %cst_51 [1] : vector<24x32xf32> to vector<24xf32>
      %119 = vector.shape_cast %118 : vector<24xf32> to vector<24x1xf32>
      %cst_52 = arith.constant 3.100000e+01 : f32
      %120 = vector.broadcast %cst_52 : f32 to vector<24x1xf32>
      %121 = arith.divf %119, %120 : vector<24x1xf32>
      %122 = vector.broadcast %114 : vector<24x1xf32> to vector<24x32xf32>
      %123 = arith.subf %110, %122 : vector<24x32xf32>
      %124 = vector.broadcast %4 : vector<1x32xf32> to vector<24x32xf32>
      %125 = arith.mulf %124, %123 : vector<24x32xf32>
      %126 = math.sqrt %121 : vector<24x1xf32>
      %cst_53 = arith.constant 9.99999997E-7 : f32
      %127 = vector.broadcast %cst_53 : f32 to vector<24x1xf32>
      %128 = arith.addf %126, %127 : vector<24x1xf32>
      %129 = vector.broadcast %128 : vector<24x1xf32> to vector<24x32xf32>
      %130 = arith.divf %125, %129 : vector<24x32xf32>
      %131 = vector.broadcast %5 : vector<1x32xf32> to vector<24x32xf32>
      %132 = arith.addf %130, %131 : vector<24x32xf32>
      %c0_54 = arith.constant 0 : index
      %c0_55 = arith.constant 0 : index
      %133 = vector.load %arg9[%c0_54, %c0_55] : memref<32x128xf32, #tpu.memory_space<vmem>>, vector<32x128xf32>
      %cst_56 = arith.constant dense<0.000000e+00> : vector<24x128xf32>
      %134 = tpu.matmul %132, %133, %cst_56 {dimension_numbers = #tpu.dot_dimension_numbers<[1], [0], [0], [1], [0, 0, 1, 1], [], []>} : vector<24x32xf32>, vector<32x128xf32>, vector<24x128xf32> -> vector<24x128xf32>
      %c0_57 = arith.constant 0 : index
      %c0_58 = arith.constant 0 : index
      %135 = vector.load %arg10[%c0_57, %c0_58] : memref<1x128xf32, #tpu.memory_space<vmem>>, vector<1x128xf32>
      %136 = vector.broadcast %135 : vector<1x128xf32> to vector<24x128xf32>
      %137 = arith.addf %134, %136 : vector<24x128xf32>
      %cst_59 = arith.constant 5.000000e-01 : f32
      %138 = vector.broadcast %cst_59 : f32 to vector<24x128xf32>
      %139 = arith.mulf %138, %137 : vector<24x128xf32>
      %cst_60 = arith.constant 0.707106769 : f32
      %140 = vector.broadcast %cst_60 : f32 to vector<24x128xf32>
      %141 = arith.mulf %137, %140 : vector<24x128xf32>
      %142 = math.erf %141 : vector<24x128xf32>
      %cst_61 = arith.constant 1.000000e+00 : f32
      %143 = vector.broadcast %cst_61 : f32 to vector<24x128xf32>
      %144 = arith.addf %143, %142 : vector<24x128xf32>
      %145 = arith.mulf %139, %144 : vector<24x128xf32>
      %c0_62 = arith.constant 0 : index
      %c0_63 = arith.constant 0 : index
      %146 = vector.load %arg11[%c0_62, %c0_63] : memref<128x32xf32, #tpu.memory_space<vmem>>, vector<128x32xf32>
      %cst_64 = arith.constant dense<0.000000e+00> : vector<24x32xf32>
      %147 = tpu.matmul %145, %146, %cst_64 {dimension_numbers = #tpu.dot_dimension_numbers<[1], [0], [0], [1], [0, 0, 1, 1], [], []>} : vector<24x128xf32>, vector<128x32xf32>, vector<24x32xf32> -> vector<24x32xf32>
      %c0_65 = arith.constant 0 : index
      %c0_66 = arith.constant 0 : index
      %148 = vector.load %arg12[%c0_65, %c0_66] : memref<1x32xf32, #tpu.memory_space<vmem>>, vector<1x32xf32>
      %149 = vector.broadcast %148 : vector<1x32xf32> to vector<24x32xf32>
      %150 = arith.addf %147, %149 : vector<24x32xf32>
      %151 = arith.addf %110, %150 : vector<24x32xf32>
      scf.yield %151 : vector<24x32xf32>
    }
    %22 = vector.extract_strided_slice %21 {offsets = [0, 0], sizes = [1, 32], strides = [1, 1]} : vector<24x32xf32> to vector<1x32xf32>
    %cst_15 = arith.constant dense<0.000000e+00> : vector<1xf32>
    %23 = vector.multi_reduction <add>, %22, %cst_15 [1] : vector<1x32xf32> to vector<1xf32>
    %24 = vector.shape_cast %23 : vector<1xf32> to vector<1x1xf32>
    %cst_16 = arith.constant 3.200000e+01 : f32
    %25 = vector.broadcast %cst_16 : f32 to vector<1x1xf32>
    %26 = arith.divf %24, %25 : vector<1x1xf32>
    %27 = vector.broadcast %26 : vector<1x1xf32> to vector<1x32xf32>
    %28 = arith.subf %22, %27 : vector<1x32xf32>
    %29 = arith.mulf %28, %28 : vector<1x32xf32>
    %cst_17 = arith.constant dense<0.000000e+00> : vector<1xf32>
    %30 = vector.multi_reduction <add>, %29, %cst_17 [1] : vector<1x32xf32> to vector<1xf32>
    %31 = vector.shape_cast %30 : vector<1xf32> to vector<1x1xf32>
    %cst_18 = arith.constant 3.200000e+01 : f32
    %32 = vector.broadcast %cst_18 : f32 to vector<1x1xf32>
    %33 = arith.divf %31, %32 : vector<1x1xf32>
    %34 = vector.broadcast %26 : vector<1x1xf32> to vector<1x32xf32>
    %35 = arith.subf %22, %34 : vector<1x32xf32>
    %cst_19 = arith.constant 9.99999974E-6 : f32
    %36 = vector.broadcast %cst_19 : f32 to vector<1x1xf32>
    %37 = arith.addf %33, %36 : vector<1x1xf32>
    %38 = math.rsqrt %37 : vector<1x1xf32>
    %39 = vector.broadcast %38 : vector<1x1xf32> to vector<1x32xf32>
    %40 = arith.mulf %35, %39 : vector<1x32xf32>
    %41 = arith.mulf %40, %6 : vector<1x32xf32>
    %42 = arith.addf %41, %7 : vector<1x32xf32>
    %c0_20 = arith.constant 0 : index
    %c0_21 = arith.constant 0 : index
    %43 = vector.load %arg13[%c0_20, %c0_21] : memref<32x128xf32, #tpu.memory_space<vmem>>, vector<32x128xf32>
    %cst_22 = arith.constant dense<0.000000e+00> : vector<1x128xf32>
    %44 = tpu.matmul %42, %43, %cst_22 {dimension_numbers = #tpu.dot_dimension_numbers<[1], [0], [0], [1], [0, 0, 1, 1], [], []>} : vector<1x32xf32>, vector<32x128xf32>, vector<1x128xf32> -> vector<1x128xf32>
    %c0_23 = arith.constant 0 : index
    %c0_24 = arith.constant 0 : index
    %45 = vector.load %arg14[%c0_23, %c0_24] : memref<1x128xf32, #tpu.memory_space<vmem>>, vector<1x128xf32>
    %46 = arith.addf %44, %45 : vector<1x128xf32>
    %47 = vector.shape_cast %46 : vector<1x128xf32> to vector<1x1x128xf32>
    %c0_25 = arith.constant 0 : index
    %c0_26 = arith.constant 0 : index
    %c0_27 = arith.constant 0 : index
    %48 = vector.load %arg15[%c0_25, %c0_26, %c0_27] : memref<1x1x128xf32, #tpu.memory_space<vmem>>, vector<1x1x128xf32>
    tpu.vector_store %arg15[%c0_25, %c0_26, %c0_27], %47 {strides = array<i32>} : memref<1x1x128xf32, #tpu.memory_space<vmem>>, vector<1x1x128xf32>,
    return
  }
  func.func @transform_0(%arg0: i32) -> (i32, i32) {
    %c0_i32 = arith.constant 0 : i32
    %c0_i32_0 = arith.constant 0 : i32
    return %arg0, %c0_i32 : i32, i32
  }
  func.func @transform_1(%arg0: i32) -> (i32, i32) {
    %c0_i32 = arith.constant 0 : i32
    %c0_i32_0 = arith.constant 0 : i32
    %c0_i32_1 = arith.constant 0 : i32
    return %c0_i32, %c0_i32_0 : i32, i32
  }
  func.func @transform_2(%arg0: i32) -> (i32, i32) {
    %c0_i32 = arith.constant 0 : i32
    %c0_i32_0 = arith.constant 0 : i32
    %c0_i32_1 = arith.constant 0 : i32
    return %c0_i32, %c0_i32_0 : i32, i32
  }
  func.func @transform_3(%arg0: i32) -> (i32, i32) {
    %c0_i32 = arith.constant 0 : i32
    %c0_i32_0 = arith.constant 0 : i32
    %c0_i32_1 = arith.constant 0 : i32
    return %c0_i32, %c0_i32_0 : i32, i32
  }
  func.func @transform_4(%arg0: i32) -> (i32, i32) {
    %c0_i32 = arith.constant 0 : i32
    %c0_i32_0 = arith.constant 0 : i32
    %c0_i32_1 = arith.constant 0 : i32
    return %c0_i32, %c0_i32_0 : i32, i32
  }
  func.func @transform_5(%arg0: i32) -> (i32, i32) {
    %c0_i32 = arith.constant 0 : i32
    %c0_i32_0 = arith.constant 0 : i32
    %c0_i32_1 = arith.constant 0 : i32
    return %c0_i32, %c0_i32_0 : i32, i32
  }
  func.func @transform_6(%arg0: i32) -> (i32, i32) {
    %c0_i32 = arith.constant 0 : i32
    %c0_i32_0 = arith.constant 0 : i32
    %c0_i32_1 = arith.constant 0 : i32
    return %c0_i32, %c0_i32_0 : i32, i32
  }
  func.func @transform_7(%arg0: i32) -> (i32, i32) {
    %c0_i32 = arith.constant 0 : i32
    %c0_i32_0 = arith.constant 0 : i32
    %c0_i32_1 = arith.constant 0 : i32
    return %c0_i32, %c0_i32_0 : i32, i32
  }
  func.func @transform_8(%arg0: i32) -> (i32, i32) {
    %c0_i32 = arith.constant 0 : i32
    %c0_i32_0 = arith.constant 0 : i32
    %c0_i32_1 = arith.constant 0 : i32
    return %c0_i32, %c0_i32_0 : i32, i32
  }
  func.func @transform_9(%arg0: i32) -> (i32, i32) {
    %c0_i32 = arith.constant 0 : i32
    %c0_i32_0 = arith.constant 0 : i32
    %c0_i32_1 = arith.constant 0 : i32
    return %c0_i32, %c0_i32_0 : i32, i32
  }
  func.func @transform_10(%arg0: i32) -> (i32, i32) {
    %c0_i32 = arith.constant 0 : i32
    %c0_i32_0 = arith.constant 0 : i32
    %c0_i32_1 = arith.constant 0 : i32
    return %c0_i32, %c0_i32_0 : i32, i32
  }
  func.func @transform_11(%arg0: i32) -> (i32, i32) {
    %c0_i32 = arith.constant 0 : i32
    %c0_i32_0 = arith.constant 0 : i32
    %c0_i32_1 = arith.constant 0 : i32
    return %c0_i32, %c0_i32_0 : i32, i32
  }
  func.func @transform_12(%arg0: i32) -> (i32, i32) {
    %c0_i32 = arith.constant 0 : i32
    %c0_i32_0 = arith.constant 0 : i32
    %c0_i32_1 = arith.constant 0 : i32
    return %c0_i32, %c0_i32_0 : i32, i32
  }
  func.func @transform_13(%arg0: i32) -> (i32, i32) {
    %c0_i32 = arith.constant 0 : i32
    %c0_i32_0 = arith.constant 0 : i32
    %c0_i32_1 = arith.constant 0 : i32
    return %c0_i32, %c0_i32_0 : i32, i32
  }
  func.func @transform_14(%arg0: i32) -> (i32, i32, i32) {
    %c0_i32 = arith.constant 0 : i32
    %c0_i32_0 = arith.constant 0 : i32
    %c0_i32_1 = arith.constant 0 : i32
    return %arg0, %c0_i32, %c0_i32_0 : i32, i32, i32
  }
}

</mosaic_0001>

<bundles_post_ra>
// kernel: vit_forward.1
= control target key start
LH: loop header
LB: loop body
LE: loop exit
PB: predicated region body
PF: predicated region fallthrough
CT: control target
= control target key end

     0   :  { %s6023_s0 = inlined_call_operand.vmem [shape: f32[32,48], index: 0, kind: input, shape index: {}]   ;;  %s6024_s1 = inlined_call_operand.vmem [shape: f32[48,32], index: 1, kind: input, shape index: {}]   ;;  %s6025_s2 = inlined_call_operand.vmem [shape: f32[24,32], index: 2, kind: input, shape index: {}]   ;;  %s6026_s3 = inlined_call_operand.vmem [shape: f32[8,32], index: 3, kind: input, shape index: {}]   ;;  %s6027_s4 = inlined_call_operand.vmem [shape: f32[32,96], index: 4, kind: input, shape index: {}]   ;;  %s6028_s5 = inlined_call_operand.vmem [shape: f32[1,96], index: 5, kind: input, shape index: {}]   ;;  %s6029_s6 = inlined_call_operand.vmem [shape: f32[32,32], index: 6, kind: input, shape index: {}]   ;;  %s6030_s7 = inlined_call_operand.vmem [shape: f32[1,32], index: 7, kind: input, shape index: {}]   ;;  %s6031_s8 = inlined_call_operand.vmem [shape: f32[32,128], index: 8, kind: input, shape index: {}]   ;;  %s6032_s9 = inlined_call_operand.vmem [shape: f32[1,128], index: 9, kind: input, shape index: {}]   ;;  %s6033_s10 = inlined_call_operand.vmem [shape: f32[128,32], index: 10, kind: input, shape index: {}]   ;;  %s6034_s11 = inlined_call_operand.vmem [shape: f32[1,32], index: 11, kind: input, shape index: {}]   ;;  %s6035_s12 = inlined_call_operand.vmem [shape: f32[32,128], index: 12, kind: input, shape index: {}]   ;;  %s6036_s13 = inlined_call_operand.vmem [shape: f32[1,128], index: 13, kind: input, shape index: {}]   ;;  %s6037_s14 = inlined_call_operand.hbm [shape: f32[2,1,128], index: 14, kind: output, shape index: {}]  }
   0x1   :  { %6042 = sst [smem:[#allocation8_spill]] %s6023_s0 }
   0x2   :  { %19 = vsyncpa [#allocation3], 0 }
   0x3   :  { %21 = vsyncpa [#allocation3 + $0x1], 0  ;;  %s4818_s29 = smov 0   ;;  %s4820_s30 = smov 0  }
   0x4   :  { %s4822_s15 = smov 0   ;;  %s4824_s16 = smov 0  }
   0x5 LB: > { %6043 = sst [smem:[#allocation5_spill]] %s4706_s15  ;;  %s4839_s17 = sadd.s32 4294967295, %s4710_s16   ;;  %s4710_s16 = sphi %s4824_s16, %s6053_s16   ;;  %s4706_s15 = sphi %s4822_s15, %s6055_s15   ;;  %s4702_s30 = sphi %s4820_s30, %s6057_s30   ;;  %s4698_s29 = sphi %s4818_s29, %s6056_s29  }
   0x6   : > { %s4040_s18 = sadd.s32 4294967294, %s4710_s16   ;;  %s4843_s19 = sadd.s32 1, %s4710_s16  }
   0x7   : > { %6044 = sst [smem:[#allocation6_spill]] %s4843_s19  ;;  %s333_s20 = sadd.s32 1, %s4706_s15 }
   0x8   : > { %s330_s21 = ssub.s32 %s4710_s16, %s4843_s19  ;;  %p343_p0 = scmp.ne.s32.totalorder %s4706_s15, %s4702_s30 }
   0x9   : > { %p331_p1 = scmp.eq.s32.totalorder %s330_s21, 0  ;;  %p344_p2 = scmp.eq.s32.totalorder %s4839_s17, 1 }
   0xa   : > { %p349_p3 = scmp.ne.s32.totalorder %s4702_s30, %s4698_s29  ;;  %p350_p4 = scmp.eq.s32.totalorder %s4040_s18, 1 }
   0xb   : > { %s4854_s22 = scalar_select %p331_p1, %s4706_s15, %s333_s20  }
   0xc   : > { %p4856_p5 = por %p344_p2, %p343_p0  ;;  %p4860_p6 = por %p350_p4, %p349_p3 }
   0xd   : > { %6045 = sst [smem:[#allocation7_spill]] %s4854_s22  ;;  %p4043_p7 = scmp.ge.s32.totalorder %s4710_s16, 1 }
   0xe   : > { %p416_p8 = scmp.lt.s32.totalorder %s4710_s16, 3 }
  0x10   : > { %p417_p9 = pnand %p4043_p7, %p416_p8 }
  0x11   : > { %s4044_s22 = sshll.u32 (!%p417_p9), %s4839_s17, 1  ;;  %s6048_s0 = sld [smem:[#allocation8_spill]] (!%p417_p9) }
  0x12   : > { %420 = sbr.rel (%p417_p9) target bundleno = 3353 (0xd19), region = 76  ;;  %p462_p10 = scmp.lt.s32.totalorder (!%p417_p9), %s4044_s22, 3 }
  0x13   : > { %s4948_s27 = smov (!%p417_p9), 0  }
  0x17   : > { %v4870_v0 = vld [vmem:[%s6026_s3 + $0x2] ss:$0 sm:$0xff]  ;;  %v4875_v1 = vld [vmem:[%s6026_s3 + $0x3] ss:$0 sm:$0xff]  ;;  %v482_v2 = vld [vmem:[%s6024_s1 + $0x28] sm:$0xff]  ;;  %s6059_s22 = smov (!%p462_p10, %s4044_s22), 3  ;;  %v6041_v14 = vlaneseq }
  0x18   : > { %v4883_v3 = vld [vmem:[%s6026_s3 + $0x4] ss:$0 sm:$0xff]  ;;  %v4888_v4 = vld [vmem:[%s6026_s3 + $0x5] ss:$0 sm:$0xff]  ;;  %4231 = vmatprep.subr.mxu0 %v482_v2  ;;  %v4896_v6 = vld [vmem:[%s6026_s3 + $0x6] sm:$0x1] }
  0x19   : > { %v481_v5 = vld [vmem:[%s6024_s1 + $0x20] sm:$0xff]  ;;  %4232 = vmatpush3.msra.mxu0 %v482_v2  ;;  %v480_v8 = vld [vmem:[%s6024_s1 + $0x18] sm:$0xff]  ;;  %v479_v9 = vld [vmem:[%s6024_s1 + $0x10] sm:$0xff]  ;;  %s4045_s18 = sshll.u32 %s6059_s22, 3  ;;  %vm487_vm0 = vcmask 392192   ;;  %v4920_v15 = vand.u32 127, %v6041_v14 }
  0x1a   : > { %v4901_v7 = vld [vmem:[%s6026_s3 + $0x7] sm:$0x1]  ;;  %4233 = vmatprep.subr.mxu0 %v481_v5  ;;  %v478_v10 = vld [vmem:[%s6024_s1 + $0x8] sm:$0xff]  ;;  %s465_s25 = scalar_lea.vmem %s6048_s0, %s4045_s18  ;;  %v4046_v16 = vld [vmem:[%s6026_s3] ss:$0 sm:$0xff]  ;;  %vm571_vm2 = vcmask 1040384  }
  0x1b   : > { %4234 = vmatpush3.msra.mxu0 %v481_v5  ;;  %v477_v11 = vld [vmem:[%s6024_s1] sm:$0xff]  ;;  %v476_v13 = vld [vmem:[%s465_s25 + $0x8] sm:$0xff]  ;;  %vm588_vm1 = vcmp.lt.s32.totalorder %v4920_v15, 17  ;;  %v582_v21 = vld [vmem:[%s6025_s2 + $0x10] sm:$0xff]  ;;  %s6049_s22 = sand.u32 1, %s4702_s30  }
  0x1c   : > { %4235 = vmatprep.subr.mxu0 %v480_v8  ;;  %v475_v12 = vld [vmem:[%s465_s25] sm:$0xff]  ;;  %v581_v27 = vld [vmem:[%s6025_s2 + $0x8] sm:$0xff]  ;;  %s4940_s26 = scalar_lea.vmem [#allocation2], %s6049_s22 }
  0x1d   : > { %4236 = vmatpush3.msra.mxu0 %v480_v8  ;;  %4243 = vmatprep.mubr.msk.f32.mxu0 %vm487_vm0, %v475_v12  ;;  %v468_v23 = vld [vmem:[%s6026_s3 + $0x1] sm:$0x1] }
  0x1e   : > { %4237 = vmatprep.subr.mxu0 %v479_v9  ;;  %v580_v26 = vld [vmem:[%s6025_s2] sm:$0xff] }
  0x1f   : > { %4238 = vmatpush3.msra.mxu0 %v479_v9 }
  0x20   : > { %4239 = vmatprep.subr.mxu0 %v478_v10 }
  0x21   : > { %4240 = vmatpush3.msra.mxu0 %v478_v10 }
  0x22   : > { %4241 = vmatprep.subr.mxu0 %v477_v11 }
  0x23   : > { %4242 = vmatpush3.msra.mxu0 %v477_v11 }
  0x24   : > { %4244 = vmatmul.mubr.msk.f32.vlgmr.msra.gmra.mxu0 %vm487_vm0, %v476_v13 }
  0xe4   : > { %v4245_v17 = vpop.f32.mrf.mxu0 }
  0xe5   : > { %v566_v18 = vadd.f32 %v4245_v17, %v4046_v16 }
  0xe6   : > { %v560_v19 = vpop.f32.mrf.mxu0 }
  0xe7   : > { %v573_v20 = vrot.slane %v566_v18, 7  ;;  %v561_v22 = vadd.f32 %v4046_v16, %v560_v19 }
  0xe9   : > { %v579_v24 = vsel %vm571_vm2, %v573_v20, 0.0  ;;  %v572_v25 = vrot.slane %v561_v22, 7 }
  0xea   : > { %v585_v28 = vadd.f32 %v582_v21, %v579_v24  }
  0xeb   : > { %v574_v29 = vsel %vm571_vm2, %v572_v25, %v573_v20  ;;  %v578_v30 = vsel %vm571_vm2, %v468_v23, %v572_v25 }
  0xec   : > { %v583_v31 = vadd.f32 %v580_v26, %v578_v30   ;;  %v584_v32 = vadd.f32 %v581_v27, %v574_v29  }
  0xed LB: >> { %vm598_vm3 = vcmask 261120   ;;  %v678_v51 = vld [vmem:[%s6027_s4 + $0x18] sm:$0xff]  ;;  %v4728_v52 = vmov 0.0   ;;  %v677_v53 = vld [vmem:[%s6027_s4 + $0x10] sm:$0xff]  ;;  %vm4729_vm4 = vmmov 0   ;;  %v676_v54 = vld [vmem:[%s6027_s4 + $0x8] sm:$0xff]  ;;  %v6050_v14 = vlaneseq  ;;  %s4726_s27 = sphi %s4948_s27, %s594_s27   ;;  %v4722_v31 = vphi %v583_v31, %v6051_v31   ;;  %v4718_v32 = vphi %v584_v32, %v3859_v32   ;;  %v4714_v28 = vphi %v585_v28, %v3860_v28  }
  0xee   : >> { %v599_v33 = vsel %vm598_vm3, %v4722_v31, 0.0  ;;  %v605_v34 = vsel %vm598_vm3, %v4714_v28, 0.0  ;;  %v602_v35 = vsel %vm598_vm3, %v4718_v32, 0.0  ;;  %4246 = vmatprep.subr.mxu0 %v4728_v52  ;;  %4254 = vmatprep.mubr.msk.f32.mxu0 %vm4729_vm4, %v4728_v52  ;;  %v675_v55 = vld [vmem:[%s6027_s4] sm:$0xff]  ;;  %s4730_s20 = smov 112   ;;  %s4731_s21 = smov 120  }
  0xef   : >> { %600 = vadd.xlane.f32.xlu0 %v599_v33  ;;  %606 = vadd.xlane.f32.xlu1 %v605_v34  ;;  %s4732_s15 = smov 104   ;;  %s4733_s19 = smov 96   ;;  %vm2101_vm11 = vcmask 64512   ;;  %vm2520_vm12 = vcmask 195584   ;;  %vm3456_vm13 = vcmask 130048  }
  0xf0   : >> { %4247 = vmatpush3.msra.mxu0 %v678_v51  ;;  %4293 = vmatprep.subr.mxu1 %v4728_v52  ;;  %s4734_s25 = smov 64   ;;  %s4737_s22 = smov 16  }
  0xf1   : >> { %4248 = vmatprep.subr.mxu0 %v4728_v52  ;;  %4299 = vmatprep.mubr.msk.f32.mxu1 %vm4729_vm4, %v4728_v52  ;;  %s4738_s28 = smov 8   ;;  %s4739_s18 = smov 24  }
  0xf2   : >> { %4249 = vmatpush3.msra.mxu0 %v677_v53  ;;  %s594_s27 = sadd.s32 1, %s4726_s27  }
  0xf3   : >> { %603 = vadd.xlane.f32.xlu0 %v602_v35  ;;  %4250 = vmatprep.subr.mxu0 %v4728_v52  ;;  %p591_p11 = scmp.ge.s32.totalorder %s594_s27, 2  }
  0xf4   : >> { %4251 = vmatpush3.msra.mxu0 %v676_v54 }
  0xf5   : >> { %4252 = vmatprep.subr.mxu0 %v4728_v52 }
  0xf6   : >> { %4253 = vmatpush3.msra.mxu0 %v675_v55 }
  0xf7   : >> { %4263 = vmatprep.subr.mxu0 %v4728_v52 }
 0x178   : >> { %v601_v36 = vpop.xlane.xlu0 %600  ;;  %v607_v37 = vpop.xlane.xlu1 %606 }
 0x179   : >> { %v609_v38 = vmul.f32 0.03125, %v601_v36  ;;  %v611_v39 = vmul.f32 0.03125, %v607_v37 }
 0x17b   : >> { %v4969_v40 = vsub.f32 %v4722_v31, %v609_v38  ;;  %v4972_v41 = vsub.f32 %v4714_v28, %v611_v39 }
 0x17c   : >> { %v604_v42 = vpop.xlane.xlu0 %603 }
 0x17d   : >> { %v610_v43 = vmul.f32 0.03125, %v604_v42  ;;  %v615_v44 = vmul.f32 %v4969_v40, %v4969_v40  ;;  %v617_v45 = vmul.f32 %v4972_v41, %v4972_v41  ;;  %v635_v24 = vmul.f32 %v4870_v0, %v4969_v40 }
 0x17e   : >> { %v637_v34 = vmul.f32 %v4870_v0, %v4972_v41  ;;  %v4051_v41 = vld [vmem:[%s6028_s5] ss:$0 sm:$0xff] }
 0x17f   : >> { %v4979_v46 = vsub.f32 %v4718_v32, %v610_v43  ;;  %v618_v47 = vsel %vm598_vm3, %v615_v44, 0.0  ;;  %v624_v49 = vsel %vm598_vm3, %v617_v45, 0.0 }
 0x180   : >> { %619 = vadd.xlane.f32.xlu1 %v618_v47 }
 0x181   : >> { %v616_v48 = vmul.f32 %v4979_v46, %v4979_v46  ;;  %v636_v27 = vmul.f32 %v4870_v0, %v4979_v46  ;;  %v3879_v0 = vld [vmem:[%s6035_s12 + $0x8] sm:$0xff] (%p591_p11) }
 0x183   : >> { %v621_v50 = vsel %vm598_vm3, %v616_v48, 0.0 }
 0x184   : >> { %622 = vadd.xlane.f32.xlu0 %v621_v50  ;;  %625 = vadd.xlane.f32.xlu1 %v624_v49 }
 0x209   : >> { %v620_v56 = vpop.xlane.xlu1 %619 }
 0x20a   : >> { %v628_v57 = vmul.f32 0.032258064, %v620_v56 }
 0x20c   : >> { %4554 = vrsqrt.f32 %v628_v57  ;;  %vm640_vm5 = vcmp.eq.f32.partialorder %v628_v57, inf  ;;  %v643_v2 = vand.u32 2147483648, %v628_v57  ;;  %vm642_vm6 = vcmp.eq.f32.partialorder %v628_v57, 0.0 }
 0x20d   : >> { %v623_v58 = vpop.xlane.xlu0 %622  ;;  %v626_v59 = vpop.xlane.xlu1 %625 }
 0x20e   : >> { %v629_v60 = vmul.f32 0.032258064, %v623_v58  ;;  %v630_v61 = vmul.f32 0.032258064, %v626_v59  ;;  %v4735_v59 = vmov 1983009808  }
 0x210   : >> { %4556 = vrsqrt.f32 %v629_v60  ;;  %vm647_vm7 = vcmp.eq.f32.partialorder %v629_v60, inf  ;;  %vm649_vm8 = vcmp.eq.f32.partialorder %v629_v60, 0.0  ;;  %v650_v13 = vand.u32 2147483648, %v629_v60 }
 0x211   : >> { %4558 = vrsqrt.f32 %v630_v61  ;;  %vm654_vm9 = vcmp.eq.f32.partialorder %v630_v61, inf  ;;  %v657_v18 = vand.u32 2147483648, %v630_v61  ;;  %vm656_vm10 = vcmp.eq.f32.partialorder %v630_v61, 0.0 }
 0x219   : >> { %v4555_v62 = vpop.eup %4554 }
 0x21a   : >> { %v639_v63 = vmul.f32 %v4555_v62, %v628_v57  ;;  %v811_v62 = vshrl.u32 %v6050_v14, 7 }
 0x21c   : >> { %v641_v5 = vsel %vm640_vm5, %v628_v57, %v639_v63  ;;  %v4736_v63 = vmov 1934713408  }
 0x21d   : >> { %v4557_v8 = vpop.eup %4556  ;;  %v644_v9 = vsel %vm642_vm6, %v643_v2, %v641_v5  ;;  %v840_v2 = vunpack.c.l.s4 %v4736_v63 }
 0x21e   : >> { %v4559_v10 = vpop.eup %4558  ;;  %v659_v11 = vadd.f32 1e-06, %v644_v9  ;;  %v646_v12 = vmul.f32 %v4557_v8, %v629_v60 }
 0x21f   : >> { %v653_v16 = vmul.f32 %v4559_v10, %v630_v61 }
 0x220   : >> { %4560 = vrcp.f32 %v659_v11  ;;  %v648_v17 = vsel %vm647_vm7, %v629_v60, %v646_v12  ;;  %v808_v60 = vunpack.c.l.s4 %v4735_v59  ;;  %vm4741_vm7 = vmmov (%p591_p11), 0  }
 0x221   : >> { %v651_v19 = vsel %vm649_vm8, %v650_v13, %v648_v17  ;;  %v655_v20 = vsel %vm654_vm9, %v630_v61, %v653_v16  ;;  %v841_v16 = vunpack.c.0.s8 %v840_v2 }
 0x222   : >> { %v660_v21 = vadd.f32 1e-06, %v651_v19  ;;  %v658_v22 = vsel %vm656_vm10, %v657_v18, %v655_v20  ;;  %v809_v61 = vunpack.c.0.s8 %v808_v60 }
 0x223   : >> { %v661_v23 = vadd.f32 1e-06, %v658_v22 }
 0x224   : >> { %4562 = vrcp.f32 %v660_v21  ;;  %v5069_v8 = vsub.s32 %v809_v61, %v811_v62 }
 0x225   : >> { %4564 = vrcp.f32 %v661_v23 }
 0x22d   : >> { %v4561_v25 = vpop.eup %4560 }
 0x22e   : >> { %v663_v26 = vmul.f32 %v4561_v25, %v635_v24  ;;  %v5089_v25 = vsub.s32 %v841_v16, %v811_v62 }
 0x230   : >> { %v672_v29 = vadd.f32 %v4875_v1, %v663_v26 }
 0x231   : >> { %v4563_v30 = vpop.eup %4562 }
 0x232   : >> { %v4565_v33 = vpop.eup %4564  ;;  %4255 = vmatmul.mubr.msk.f32.vlgmr.msra.gmra.mxu0 %vm598_vm3, %v672_v29  ;;  %v665_v35 = vmul.f32 %v4563_v30, %v636_v27 }
 0x233   : >> { %4257 = vmatprep.mubr.msk.f32.mxu0 %vm4729_vm4, %v4728_v52  ;;  %v667_v37 = vmul.f32 %v4565_v33, %v637_v34 }
 0x234   : >> { %v673_v36 = vadd.f32 %v4875_v1, %v665_v35 }
 0x235   : >> { %v674_v38 = vadd.f32 %v4875_v1, %v667_v37  ;;  %v3878_v1 = vld [vmem:[%s6035_s12] sm:$0xff] (%p591_p11) }
 0x236   : >> { %4258 = vmatmul.mubr.msk.f32.gmra.mxu0 %vm598_vm3, %v673_v36 }
 0x237   : >> { %4260 = vmatprep.mubr.msk.f32.mxu0 %vm4729_vm4, %v4728_v52 }
 0x23a   : >> { %4261 = vmatmul.mubr.msk.f32.gmra.mxu0 %vm598_vm3, %v674_v38 }
 0x23b   : >> { %4269 = vmatprep.mubr.msk.f32.mxu0 %vm4729_vm4, %v4728_v52 }
 0x2f2   : >> { %v761_v39 = vpop.f32.mrf.mxu0 }
 0x2f3   : >> { %v5033_v48 = vadd.f32 %v4051_v41, %v761_v39 }
 0x2f4   : >> { %v4256_v40 = vpop.f32.mrf.mxu0 }
 0x2f6   : >> { %v766_v42 = vpop.f32.mrf.mxu0 }
 0x2f7   : >> { %v5029_v43 = vadd.f32 %v4051_v41, %v766_v42 }
 0x2f8   : >> { %v4259_v44 = vpop.f32.mrf.mxu0 }
 0x2f9   : >> { %789 = vrot.lane.b32.xlu0 %v5029_v43, %s4730_s20  ;;  %780 = vrot.lane.b32.xlu1 %v5029_v43, %s4731_s21 }
 0x2fa   : >> { %v771_v45 = vpop.f32.mrf.mxu0 }
 0x2fb   : >> { %v772_v46 = vadd.f32 %v4051_v41, %v771_v45 }
 0x2fc   : >> { %v4262_v47 = vpop.f32.mrf.mxu0 }
 0x2fd   : >> { %791 = vrot.lane.b32.xlu1 %v772_v46, %s4730_s20  ;;  %782 = vrot.lane.b32.xlu0 %v772_v46, %s4731_s21 }
 0x301   : >> { %800 = vrot.lane.b32.xlu1 %v772_v46, %s4732_s15  ;;  %778 = vrot.lane.b32.xlu0 %v5033_v48, %s4731_s21 }
 0x305   : >> { %798 = vrot.lane.b32.xlu1 %v5029_v43, %s4732_s15  ;;  %796 = vrot.lane.b32.xlu0 %v5033_v48, %s4732_s15 }
 0x309   : >> { %787 = vrot.lane.b32.xlu1 %v5033_v48, %s4730_s20  ;;  %s3971_s20 = sshll.u32 (%p591_p11), %s4940_s26, 4  ;;  %s3972_s20 = int_to_ptr.vmem [resolvable:$true] %s3971_s20 }
 0x30a   : > { %s4634_s0 = scalar_lea.vmem (%p591_p11), %s3972_s20, 16 }
 0x30b   : > { %p4635_p12 = scmp.ne.s32.totalorder (%p591_p11), %s3972_s20, %s4634_s0 }
 0x30d   : >> { %1215 = vrot.lane.b32.xlu1 %v5029_v43, %s4733_s19  ;;  %p4636_p13 = pnand (%p591_p11), %p4635_p12, %p4856_p5 }
 0x30f   : > { %p4637_p0 = pneg (%p591_p11), %p4636_p13 }
 0x311   : >> { %1217 = vrot.lane.b32.xlu1 %v772_v46, %s4733_s19 }
 0x36b   : >> { %v5040_v49 = vpop.permute.xlu0 %789  ;;  %v5042_v50 = vpop.permute.xlu1 %780 }
 0x36c   : >> { %1227 = vrot.lane.b32.xlu1 %v5040_v49, %s4733_s19  ;;  %1221 = vrot.lane.b32.xlu0 %v5042_v50, %s4733_s19  ;;  %v873_v18 = vcombine.low %v5029_v43, %v5040_v49  ;;  %v874_v20 = vcombine.high %v5029_v43, %v5040_v49 }
 0x36e   : >> { %v881_v30 = vrot.slane %v873_v18, %v5069_v8  ;;  %v888_v35 = vrot.slane %v874_v20, %v5069_v8 }
 0x36f   : >> { %v5046_v51 = vpop.permute.xlu1 %791  ;;  %v783_v55 = vpop.permute.xlu0 %782 }
 0x370   : >> { %1229 = vrot.lane.b32.xlu1 %v5046_v51, %s4733_s19  ;;  %v941_v9 = vcombine.low %v772_v46, %v5046_v51  ;;  %v942_v13 = vcombine.high %v772_v46, %v5046_v51 }
 0x372   : >> { %v949_v21 = vrot.slane %v941_v9, %v5069_v8  ;;  %v956_v24 = vrot.slane %v942_v13, %v5069_v8 }
 0x373   : >> { %v5049_v53 = vpop.permute.xlu1 %800  ;;  %v5059_v57 = vpop.permute.xlu0 %778 }
 0x374   : >> { %1213 = vrot.lane.b32.xlu1 %v5033_v48, %s4733_s19  ;;  %v957_v5 = vcombine.low %v783_v55, %v5049_v53  ;;  %v958_v10 = vcombine.high %v783_v55, %v5049_v53 }
 0x376   : >> { %v965_v17 = vrot.slane %v957_v5, %v5069_v8  ;;  %v972_v22 = vrot.slane %v958_v10, %v5069_v8 }
 0x377   : >> { %v5052_v54 = vpop.permute.xlu1 %798  ;;  %v5063_v58 = vpop.permute.xlu0 %796 }
 0x378   : >> { %1233 = vrot.lane.b32.xlu0 %v5052_v54, %s4733_s19  ;;  %v889_v12 = vcombine.low %v5042_v50, %v5052_v54  ;;  %v890_v19 = vcombine.high %v5042_v50, %v5052_v54  ;;  %v973_v26 = vcombine.low %v949_v21, %v965_v17  ;;  %v974_v27 = vcombine.high %v949_v21, %v965_v17 }
 0x379   : >> { %v989_v36 = vcombine.low %v956_v24, %v972_v22  ;;  %v990_v37 = vcombine.high %v956_v24, %v972_v22  ;;  %v821_v38 = vcombine.low %v5059_v57, %v5063_v58  ;;  %v822_v45 = vcombine.high %v5059_v57, %v5063_v58 }
 0x37a   : >> { %v897_v23 = vrot.slane %v889_v12, %v5069_v8  ;;  %v904_v33 = vrot.slane %v890_v19, %v5069_v8  ;;  %v981_v42 = vrot.slane %v973_v26, %v5089_v25  ;;  %v988_v44 = vrot.slane %v974_v27, %v5089_v25 }
 0x37b   : >> { %v5055_v56 = vpop.permute.xlu1 %787  ;;  %v997_v60 = vrot.slane %v989_v36, %v5089_v25  ;;  %v1004_v61 = vrot.slane %v990_v37, %v5089_v25  ;;  %v829_v62 = vrot.slane %v821_v38, %v5069_v8  ;;  %v836_v12 = vrot.slane %v822_v45, %v5069_v8 }
 0x37c   : >> { %1223 = vrot.lane.b32.xlu0 %v783_v55, %s4733_s19  ;;  %1225 = vrot.lane.b32.xlu1 %v5055_v56, %s4733_s19  ;;  %v805_v34 = vcombine.low %v5033_v48, %v5055_v56  ;;  %v905_v39 = vcombine.low %v881_v30, %v897_v23  ;;  %v906_v40 = vcombine.high %v881_v30, %v897_v23 }
 0x37d   : >> { %v806_v41 = vcombine.high %v5033_v48, %v5055_v56  ;;  %v921_v47 = vcombine.low %v888_v35, %v904_v33  ;;  %v1145_v9 = vcombine.low %v981_v42, %v988_v44  ;;  %v4059_v10 = vcombine.high %v981_v42, %v988_v44 }
 0x37e   : >> { %v813_v59 = vrot.slane %v805_v34, %v5069_v8  ;;  %v913_v63 = vrot.slane %v905_v39, %v5089_v25  ;;  %v920_v2 = vrot.slane %v906_v40, %v5089_v25  ;;  %v1161_v20 = vcombine.low %v997_v60, %v1004_v61 }
 0x37f   : >> { %v5073_v11 = vpop.permute.xlu1 %1215  ;;  %v820_v5 = vrot.slane %v806_v41, %v5069_v8  ;;  %v929_v13 = vrot.slane %v921_v47, %v5089_v25  ;;  %v4060_v27 = vcombine.high %v997_v60, %v1004_v61  ;;  %v5121_v34 = vrot.slane %v1145_v9, %v5069_v8 }
 0x380   : >> { %1235 = vrot.lane.b32.xlu0 %v5049_v53, %s4733_s19  ;;  %1661 = vrot.lane.b32.xlu1 %v772_v46, %s4734_s25  ;;  %v837_v17 = vcombine.low %v813_v59, %v829_v62  ;;  %v838_v18 = vcombine.high %v813_v59, %v829_v62  ;;  %v1077_v22 = vcombine.low %v913_v63, %v920_v2 }
 0x381   : >> { %v4057_v23 = vcombine.high %v913_v63, %v920_v2  ;;  %v853_v24 = vcombine.low %v820_v5, %v836_v12  ;;  %v854_v26 = vcombine.high %v820_v5, %v836_v12  ;;  %v5126_v39 = vrot.slane %v4059_v10, %v5069_v8 }
 0x382   : >> { %v845_v36 = vrot.slane %v837_v17, %v5089_v25  ;;  %v852_v37 = vrot.slane %v838_v18, %v5089_v25  ;;  %v5129_v44 = vrot.slane %v1161_v20, %v5069_v8  ;;  %v5147_v10 = vrot.slane %v4060_v27, %v5069_v8 }
 0x383   : >> { %v5091_v29 = vpop.permute.xlu1 %1217  ;;  %v868_v45 = vrot.slane %v854_v26, %v5089_v25  ;;  %v5137_v47 = vrot.slane %v4057_v23, %v5069_v8 }
 0x384   : >> { %1219 = vrot.lane.b32.xlu0 %v5059_v57, %s4733_s19  ;;  %v1009_v63 = vcombine.low %v845_v36, %v852_v37  ;;  %v4055_v2 = vcombine.high %v845_v36, %v852_v37 }
 0x388   : >> { %1231 = vrot.lane.b32.xlu0 %v5063_v58, %s4733_s19  ;;  %s6052_s19 = sand.u32 (%p591_p11), 1, %s4702_s30  }
 0x38c   : >> { %1667 = vrot.lane.b32.xlu0 %v783_v55, %s4734_s25  ;;  %v922_v55 = vcombine.high %v888_v35, %v904_v33 }
 0x38e   : >> { %v936_v16 = vrot.slane %v922_v55, %v5089_v25 }
 0x390   : >> { %v1093_v35 = vcombine.low %v929_v13, %v936_v16  ;;  %v4058_v40 = vcombine.high %v929_v13, %v936_v16 }
 0x392   : >> { %v5144_v9 = vrot.slane %v1093_v35, %v5069_v8  ;;  %v5150_v20 = vrot.slane %v4058_v40, %v5069_v8  ;;  %v5162_v35 = vrot.slane %v4055_v2, %v5069_v8 }
 0x3de   : >> { %v1228_v46 = vpop.permute.xlu1 %1227  ;;  %v1222_v19 = vpop.permute.xlu0 %1221 }
 0x3df   : >> { %v1317_v30 = vcombine.low %v5073_v11, %v1228_v46  ;;  %v1318_v33 = vcombine.high %v5073_v11, %v1228_v46  ;;  %v861_v11 = vrot.slane %v853_v24, %v5089_v25  ;;  %v5134_v46 = vrot.slane %v1077_v22, %v5069_v8 }
 0x3e1   : >> { %v1325_v55 = vrot.slane %v1317_v30, %v5069_v8  ;;  %v1332_v59 = vrot.slane %v1318_v33, %v5069_v8  ;;  %v1025_v18 = vcombine.low %v861_v11, %v868_v45  ;;  %v1109_v22 = vcombine.low %v5134_v46, %v5137_v47 }
 0x3e2   : >> { %v5116_v21 = vpop.permute.xlu1 %1229  ;;  %v5159_v33 = vrot.slane %v1009_v63, %v5069_v8 }
 0x3e3   : >> { %v1385_v36 = vcombine.low %v5091_v29, %v5116_v21  ;;  %v1386_v37 = vcombine.high %v5091_v29, %v5116_v21 }
 0x3e5   : >> { %v1393_v21 = vrot.slane %v1385_v36, %v5069_v8 }
 0x3e6   : >> { %v1214_v60 = vpop.permute.xlu1 %1213 }
 0x3ea   : >> { %v1234_v38 = vpop.permute.xlu0 %1233 }
 0x3eb   : >> { %v1333_v41 = vcombine.low %v1222_v19, %v1234_v38  ;;  %v1334_v42 = vcombine.high %v1222_v19, %v1234_v38  ;;  %v4056_v19 = vcombine.high %v861_v11, %v868_v45 }
 0x3ed   : >> { %v1341_v61 = vrot.slane %v1333_v41, %v5069_v8  ;;  %v1348_v62 = vrot.slane %v1334_v42, %v5069_v8 }
 0x3ee   : >> { %v1224_v5 = vpop.permute.xlu0 %1223  ;;  %v1226_v30 = vpop.permute.xlu1 %1225 }
 0x3ef   : >> { %v1349_v12 = vcombine.low %v1325_v55, %v1341_v61  ;;  %v1350_v13 = vcombine.high %v1325_v55, %v1341_v61  ;;  %v1365_v16 = vcombine.low %v1332_v59, %v1348_v62  ;;  %v1366_v17 = vcombine.high %v1332_v59, %v1348_v62 }
 0x3f0   : >> { %v1249_v45 = vcombine.low %v1214_v60, %v1226_v30  ;;  %v1250_v55 = vcombine.high %v1214_v60, %v1226_v30 }
 0x3f1   : >> { %v1357_v23 = vrot.slane %v1349_v12, %v5089_v25  ;;  %v1364_v24 = vrot.slane %v1350_v13, %v5089_v25  ;;  %v1373_v26 = vrot.slane %v1365_v16, %v5089_v25  ;;  %v1380_v27 = vrot.slane %v1366_v17, %v5089_v25 }
 0x3f2   : >> { %v1236_v38 = vpop.permute.xlu0 %1235  ;;  %v1400_v12 = vrot.slane %v1386_v37, %v5069_v8  ;;  %v5185_v16 = vrot.slane %v1025_v18, %v5069_v8  ;;  %v5188_v17 = vrot.slane %v4056_v19, %v5069_v8  ;;  %v1264_v19 = vrot.slane %v1250_v55, %v5069_v8 }
 0x3f3   : >> { %v1521_v40 = vcombine.low %v1357_v23, %v1364_v24  ;;  %v4063_v41 = vcombine.high %v1357_v23, %v1364_v24  ;;  %v1537_v42 = vcombine.low %v1373_v26, %v1380_v27  ;;  %v4064_v11 = vcombine.high %v1373_v26, %v1380_v27 }
 0x3f4   : >> { %v1401_v59 = vcombine.low %v1224_v5, %v1236_v38  ;;  %v1402_v61 = vcombine.high %v1224_v5, %v1236_v38  ;;  %v1041_v23 = vcombine.low %v5159_v33, %v5162_v35  ;;  %v1125_v24 = vcombine.low %v5144_v9, %v5150_v20 }
 0x3f5   : >> { %v5169_v62 = vrot.slane %v1521_v40, %v5069_v8  ;;  %v5172_v63 = vrot.slane %v4063_v41, %v5069_v8  ;;  %v5175_v2 = vrot.slane %v1537_v42, %v5069_v8  ;;  %v5178_v29 = vrot.slane %v4064_v11, %v5069_v8 }
 0x3f6   : >> { %v1409_v60 = vrot.slane %v1401_v59, %v5069_v8  ;;  %v1416_v5 = vrot.slane %v1402_v61, %v5069_v8  ;;  %v1220_v13 = vpop.permute.xlu0 %1219  ;;  %v1257_v38 = vrot.slane %v1249_v45, %v5069_v8 }
 0x3f7   : >> { %v1553_v37 = vcombine.low %v5169_v62, %v5172_v63  ;;  %v1569_v18 = vcombine.low %v5175_v2, %v5178_v29  ;;  %v1570_v45 = vcombine.high %v5175_v2, %v5178_v29 }
 0x3f8   : >> { %v1417_v26 = vcombine.low %v1393_v21, %v1409_v60  ;;  %v1418_v27 = vcombine.high %v1393_v21, %v1409_v60  ;;  %v1433_v30 = vcombine.low %v1400_v12, %v1416_v5  ;;  %v1434_v36 = vcombine.high %v1400_v12, %v1416_v5 }
 0x3f9   : >> { %v1554_v12 = vcombine.high %v5169_v62, %v5172_v63 }
 0x3fa   : >> { %v1425_v40 = vrot.slane %v1417_v26, %v5089_v25  ;;  %v1432_v41 = vrot.slane %v1418_v27, %v5089_v25  ;;  %v1441_v42 = vrot.slane %v1433_v30, %v5089_v25  ;;  %v1448_v11 = vrot.slane %v1434_v36, %v5089_v25  ;;  %v1232_v59 = vpop.permute.xlu0 %1231 }
 0x3fb   : >> { %v1265_v61 = vcombine.low %v1220_v13, %v1232_v59  ;;  %v1266_v21 = vcombine.high %v1220_v13, %v1232_v59  ;;  %v5211_v36 = vrot.slane %v1553_v37, %v5089_v25  ;;  %v5214_v13 = vrot.slane %v1569_v18, %v5089_v25 }
 0x3fc   : >> { %v1589_v60 = vcombine.low %v1425_v40, %v1432_v41  ;;  %v4065_v55 = vcombine.high %v1425_v40, %v1432_v41  ;;  %v1605_v5 = vcombine.low %v1441_v42, %v1448_v11  ;;  %v4066_v26 = vcombine.high %v1441_v42, %v1448_v11 }
 0x3fd   : >> { %v1273_v27 = vrot.slane %v1265_v61, %v5069_v8  ;;  %v1280_v30 = vrot.slane %v1266_v21, %v5069_v8 }
 0x3fe   : >> { %v1596_v59 = vrot.slane %v1589_v60, %v5069_v8  ;;  %v1604_v62 = vrot.slane %v4065_v55, %v5069_v8  ;;  %v1612_v63 = vrot.slane %v1605_v5, %v5069_v8  ;;  %v1620_v2 = vrot.slane %v4066_v26, %v5069_v8 }
 0x3ff   : >> { %v1281_v29 = vcombine.low %v1257_v38, %v1273_v27  ;;  %v1282_v40 = vcombine.high %v1257_v38, %v1273_v27  ;;  %v1297_v41 = vcombine.low %v1264_v19, %v1280_v30  ;;  %v1298_v42 = vcombine.high %v1264_v19, %v1280_v30 }
 0x400   : >> { %v1621_v11 = vcombine.low %v1596_v59, %v1604_v62  ;;  %v1637_v61 = vcombine.low %v1612_v63, %v1620_v2  ;;  %v1622_v21 = vcombine.high %v1596_v59, %v1604_v62  ;;  %v1638_v37 = vcombine.high %v1612_v63, %v1620_v2 }
 0x401   : >> { %v1289_v14 = vrot.slane %v1281_v29, %v5089_v25  ;;  %v1296_v18 = vrot.slane %v1282_v40, %v5089_v25  ;;  %v1305_v60 = vrot.slane %v1297_v41, %v5089_v25  ;;  %v1312_v55 = vrot.slane %v1298_v42, %v5089_v25 }
 0x402   : >> { %v5225_v5 = vrot.slane %v1621_v11, %v5089_v25  ;;  %v1645_v26 = vrot.slane %v1637_v61, %v5089_v25  ;;  %v5229_v38 = vrot.slane %v1622_v21, %v5089_v25  ;;  %v5232_v19 = vrot.slane %v1638_v37, %v5089_v25 }
 0x403   : >> { %v1453_v27 = vcombine.low %v1289_v14, %v1296_v18  ;;  %v4061_v30 = vcombine.high %v1289_v14, %v1296_v18  ;;  %v1469_v59 = vcombine.low %v1305_v60, %v1312_v55  ;;  %v4062_v62 = vcombine.high %v1305_v60, %v1312_v55 }
 0x404   : >> { %v1653_v63 = vcombine.low %v5225_v5, %v1645_v26  ;;  %v1655_v2 = vcombine.low %v5229_v38, %v5232_v19  ;;  %v5238_v29 = vrot.slane %v1554_v12, %v5089_v25  ;;  %v5241_v40 = vrot.slane %v1570_v45, %v5089_v25 }
 0x405   : >> { %v1460_v41 = vrot.slane %v1453_v27, %v5069_v8  ;;  %v1468_v42 = vrot.slane %v4061_v30, %v5069_v8  ;;  %v1476_v11 = vrot.slane %v1469_v59, %v5069_v8  ;;  %v1484_v14 = vrot.slane %v4062_v62, %v5069_v8 }
 0x406   : >> { %v1057_v61 = vcombine.low %v5185_v16, %v5188_v17  ;;  %4264 = vmatpush3.xpose.msk.msra.mxu0 %vm2101_vm11, %v1653_v63  ;;  %4294 = vmatpush3.xpose.msk.msra.mxu1 %vm2101_vm11, %v1655_v2  ;;  %v1042_v12 = vcombine.high %v5159_v33, %v5162_v35  ;;  %v1058_v45 = vcombine.high %v5185_v16, %v5188_v17 }
 0x407   : >> { %v1485_v21 = vcombine.low %v1460_v41, %v1468_v42  ;;  %v1501_v37 = vcombine.low %v1476_v11, %v1484_v14  ;;  %4265 = vmatprep.subr.mxu0 %v4728_v52  ;;  %4295 = vmatprep.subr.mxu1 %v4728_v52  ;;  %v1486_v18 = vcombine.high %v1460_v41, %v1468_v42 }
 0x408   : >> { %v1585_v60 = vcombine.low %v5211_v36, %v5214_v13  ;;  %v1587_v55 = vcombine.low %v5238_v29, %v5241_v40  ;;  %v1502_v27 = vcombine.high %v1476_v11, %v1484_v14  ;;  %v1110_v30 = vcombine.high %v5134_v46, %v5137_v47 }
 0x409   : >> { %v1493_v59 = vrot.slane %v1485_v21, %v5089_v25  ;;  %v1509_v16 = vrot.slane %v1501_v37, %v5089_v25  ;;  %v5266_v17 = vrot.slane %v1486_v18, %v5089_v25  ;;  %v1126_v62 = vcombine.high %v5144_v9, %v5150_v20 }
 0x40a   : >> { %4266 = vmatpush3.xpose.msk.msra.mxu0 %vm2101_vm11, %v1585_v60  ;;  %4296 = vmatpush3.xpose.msk.msra.mxu1 %vm2101_vm11, %v1587_v55  ;;  %v5273_v63 = vrot.slane %v1502_v27, %v5089_v25  ;;  %v1049_v2 = vrot.slane %v1041_v23, %v5089_v25  ;;  %v1065_v41 = vrot.slane %v1057_v61, %v5089_v25 }
 0x40b   : >> { %4267 = vmatprep.subr.mxu0 %v4728_v52  ;;  %4297 = vmatprep.subr.mxu1 %v4728_v52  ;;  %v1517_v42 = vcombine.low %v1493_v59, %v1509_v16  ;;  %v5283_v11 = vrot.slane %v1042_v12, %v5089_v25  ;;  %v5286_v14 = vrot.slane %v1058_v45, %v5089_v25 }
 0x40c   : >> { %v1519_v21 = vcombine.low %v5266_v17, %v5273_v63  ;;  %v1117_v33 = vrot.slane %v1109_v22, %v5089_v25  ;;  %v1133_v35 = vrot.slane %v1125_v24, %v5089_v25  ;;  %v5299_v23 = vrot.slane %v1110_v30, %v5089_v25 }
 0x40d   : >> { %v5302_v61 = vrot.slane %v1126_v62, %v5089_v25  ;;  %v1177_v12 = vcombine.low %v5121_v34, %v5126_v39  ;;  %v1193_v46 = vcombine.low %v5129_v44, %v5147_v10  ;;  %v1178_v47 = vcombine.high %v5121_v34, %v5126_v39 }
 0x40e   : >> { %4268 = vmatpush3.xpose.msk.msra.mxu0 %vm2101_vm11, %v1517_v42  ;;  %4298 = vmatpush3.xpose.msk.msra.mxu1 %vm2101_vm11, %v1519_v21  ;;  %v1073_v9 = vcombine.low %v1049_v2, %v1065_v41  ;;  %v1075_v20 = vcombine.low %v5283_v11, %v5286_v14  ;;  %v1194_v22 = vcombine.high %v5129_v44, %v5147_v10 }
 0x40f   : >> { %4278 = vmatprep.subr.mxu0 %v4728_v52  ;;  %4323 = vmatprep.subr.mxu1 %v4728_v52  ;;  %v1654_v24 = vcombine.high %v5225_v5, %v1645_v26  ;;  %v1141_v34 = vcombine.low %v1117_v33, %v1133_v35  ;;  %v1143_v39 = vcombine.low %v5299_v23, %v5302_v61 }
 0x410   : >> { %v1185_v45 = vrot.slane %v1177_v12, %v5089_v25  ;;  %v1201_v44 = vrot.slane %v1193_v46, %v5089_v25  ;;  %v1192_v10 = vrot.slane %v1178_v47, %v5089_v25  ;;  %v1208_v5 = vrot.slane %v1194_v22, %v5089_v25 }
 0x411   : >> { %4270 = vmatmul.mubr.msk.f32.vlgmr.msra.gmra.mxu0 %vm2101_vm11, %v1073_v9  ;;  %4300 = vmatmul.mubr.msk.f32.vlgmr.msra.gmra.mxu1 %vm2101_vm11, %v1075_v20  ;;  %v1586_v26 = vcombine.high %v5211_v36, %v5214_v13  ;;  %v1518_v60 = vcombine.high %v1493_v59, %v1509_v16  ;;  %v1074_v36 = vcombine.high %v1049_v2, %v1065_v41 }
 0x412   : >> { %4279 = vmatpush3.xpose.msk.msra.mxu0 %vm2101_vm11, %v1654_v24  ;;  %4272 = vmatprep.mubr.msk.f32.mxu0 %vm4729_vm4, %v4728_v52  ;;  %v1209_v37 = vcombine.low %v1185_v45, %v1201_v44  ;;  %v1211_v18 = vcombine.low %v1192_v10, %v1208_v5  ;;  %v1656_v13 = vcombine.high %v5229_v38, %v5232_v19 }
 0x413   : >> { %4302 = vmatprep.mubr.msk.f32.mxu1 %vm4729_vm4, %v4728_v52  ;;  %4280 = vmatprep.subr.mxu0 %v4728_v52  ;;  %v1142_v55 = vcombine.high %v1117_v33, %v1133_v35  ;;  %v1588_v27 = vcombine.high %v5238_v29, %v5241_v40  ;;  %v1210_v38 = vcombine.high %v1185_v45, %v1201_v44 }
 0x414   : >> { %v1520_v19 = vcombine.high %v5266_v17, %v5273_v63  ;;  %v1076_v29 = vcombine.high %v5283_v11, %v5286_v14  ;;  %v1144_v40 = vcombine.high %v5299_v23, %v5302_v61  ;;  %v1212_v30 = vcombine.high %v1192_v10, %v1208_v5 }
 0x415   : >> { %4273 = vmatmul.mubr.msk.f32.gmra.mxu0 %vm2101_vm11, %v1141_v34  ;;  %4303 = vmatmul.mubr.msk.f32.gmra.mxu1 %vm2101_vm11, %v1143_v39 }
 0x416   : >> { %4281 = vmatpush3.xpose.msk.msra.mxu0 %vm2101_vm11, %v1586_v26  ;;  %4275 = vmatprep.mubr.msk.f32.mxu0 %vm4729_vm4, %v4728_v52 }
 0x417   : >> { %4305 = vmatprep.mubr.msk.f32.mxu1 %vm4729_vm4, %v4728_v52  ;;  %4282 = vmatprep.subr.mxu0 %v4728_v52 }
 0x419   : >> { %4276 = vmatmul.mubr.msk.f32.gmra.mxu0 %vm2101_vm11, %v1209_v37  ;;  %4306 = vmatmul.mubr.msk.f32.gmra.mxu1 %vm2101_vm11, %v1211_v18 }
 0x41a   : >> { %4283 = vmatpush3.xpose.msk.msra.mxu0 %vm2101_vm11, %v1518_v60  ;;  %4284 = vmatprep.mubr.msk.f32.mxu0 %vm4729_vm4, %v4728_v52 }
 0x41b   : >> { %4308 = vmatprep.subr.mxu0 %v4728_v52  ;;  %4329 = vmatprep.mubr.msk.f32.mxu1 %vm4729_vm4, %v4728_v52 }
 0x41d   : >> { %4285 = vmatmul.mubr.msk.f32.vlgmr.msra.gmra.mxu0 %vm2101_vm11, %v1074_v36 }
 0x41e   : >> { %4309 = vmatpush3.xpose.msk.msra.mxu0 %vm2101_vm11, %v1656_v13  ;;  %4287 = vmatprep.mubr.msk.f32.mxu0 %vm4729_vm4, %v4728_v52 }
 0x41f   : >> { %4310 = vmatprep.subr.mxu0 %v4728_v52 }
 0x421   : >> { %4288 = vmatmul.mubr.msk.f32.gmra.mxu0 %vm2101_vm11, %v1142_v55 }
 0x422   : >> { %4311 = vmatpush3.xpose.msk.msra.mxu0 %vm2101_vm11, %v1588_v27  ;;  %4290 = vmatprep.mubr.msk.f32.mxu0 %vm4729_vm4, %v4728_v52 }
 0x423   : >> { %4312 = vmatprep.subr.mxu0 %v4728_v52 }
 0x425   : >> { %4291 = vmatmul.mubr.msk.f32.gmra.mxu0 %vm2101_vm11, %v1210_v38 }
 0x426   : >> { %4313 = vmatpush3.xpose.msk.msra.mxu0 %vm2101_vm11, %v1520_v19  ;;  %4314 = vmatprep.mubr.msk.f32.mxu0 %vm4729_vm4, %v4728_v52 }
 0x427   : >> { %4338 = vmatprep.subr.mxu0 %v4728_v52 }
 0x429   : >> { %4315 = vmatmul.mubr.msk.f32.vlgmr.msra.gmra.mxu0 %vm2101_vm11, %v1076_v29 }
 0x42a   : >> { %4317 = vmatprep.mubr.msk.f32.mxu0 %vm4729_vm4, %v4728_v52 }
 0x42d   : >> { %4318 = vmatmul.mubr.msk.f32.gmra.mxu0 %vm2101_vm11, %v1144_v40 }
 0x42e   : >> { %4320 = vmatprep.mubr.msk.f32.mxu0 %vm4729_vm4, %v4728_v52 }
 0x431   : >> { %4321 = vmatmul.mubr.msk.f32.gmra.mxu0 %vm2101_vm11, %v1212_v30 }
 0x432   : >> { %4344 = vmatprep.mubr.msk.f32.mxu0 %vm4729_vm4, %v4728_v52 }
 0x4d1   : >> { %v2186_v59 = vpop.f32.mrf.mxu0  ;;  %v2382_v16 = vpop.f32.mrf.mxu1 }
 0x4d2   : >> { %v2494_v17 = vmul.f32 0.35355338, %v2186_v59  ;;  %v2500_v62 = vmul.f32 0.35355338, %v2382_v16 }
 0x4d3   : >> { %v4271_v63 = vpop.f32.mrf.mxu0  ;;  %v4301_v2 = vpop.f32.mrf.mxu1 }
 0x4d4   : >> { %v5387_v41 = vsel %vm588_vm1, %v2494_v17, -1e+30  ;;  %v5393_v21 = vsel %vm588_vm1, %v2500_v62, -1e+30 }
 0x4d5   : >> { %v2191_v42 = vpop.f32.mrf.mxu0  ;;  %v2387_v11 = vpop.f32.mrf.mxu1  ;;  %v2521_v14 = vsel %vm2520_vm12, %v5387_v41, -inf  ;;  %v2539_v9 = vsel %vm2520_vm12, %v5393_v21, -inf }
 0x4d6   : >> { %v2495_v33 = vmul.f32 0.35355338, %v2191_v42  ;;  %v2501_v35 = vmul.f32 0.35355338, %v2387_v11  ;;  %2522 = vmax.xlane.f32.xlu1 %v2521_v14 }
 0x4d7   : >> { %v4274_v23 = vpop.f32.mrf.mxu0  ;;  %v4304_v61 = vpop.f32.mrf.mxu1 }
 0x4d8   : >> { %v5397_v12 = vsel %vm588_vm1, %v2495_v33, -1e+30  ;;  %v5405_v22 = vsel %vm588_vm1, %v2501_v35, -1e+30 }
 0x4d9   : >> { %v2196_v46 = vpop.f32.mrf.mxu0  ;;  %v2392_v47 = vpop.f32.mrf.mxu1  ;;  %v2524_v20 = vsel %vm2520_vm12, %v5397_v12, -inf  ;;  %v2542_v44 = vsel %vm2520_vm12, %v5405_v22, -inf }
 0x4da   : >> { %v2496_v24 = vmul.f32 0.35355338, %v2196_v46  ;;  %2540 = vmax.xlane.f32.xlu1 %v2539_v9  ;;  %2525 = vmax.xlane.f32.xlu0 %v2524_v20 }
 0x4db   : >> { %v4277_v34 = vpop.f32.mrf.mxu0  ;;  %v4307_v39 = vpop.f32.mrf.mxu1 }
 0x4dc   : >> { %v5411_v10 = vsel %vm588_vm1, %v2496_v24, -1e+30  ;;  %v2502_v24 = vmul.f32 0.35355338, %v2392_v47 }
 0x4dd   : >> { %v2284_v45 = vpop.f32.mrf.mxu0  ;;  %v2527_v60 = vsel %vm2520_vm12, %v5411_v10, -inf }
 0x4de   : >> { %v2497_v5 = vmul.f32 0.35355338, %v2284_v45  ;;  %2543 = vmax.xlane.f32.xlu1 %v2542_v44  ;;  %v5459_v34 = vsel %vm588_vm1, %v2502_v24, -1e+30 }
 0x4df   : >> { %v4286_v26 = vpop.f32.mrf.mxu0 }
 0x4e0   : >> { %v5415_v37 = vsel %vm588_vm1, %v2497_v5, -1e+30 }
 0x4e1   : >> { %v2289_v18 = vpop.f32.mrf.mxu0  ;;  %v2530_v36 = vsel %vm2520_vm12, %v5415_v37, -inf }
 0x4e2   : >> { %v2498_v13 = vmul.f32 0.35355338, %v2289_v18  ;;  %2528 = vmax.xlane.f32.xlu1 %v2527_v60  ;;  %2531 = vmax.xlane.f32.xlu0 %v2530_v36 }
 0x4e3   : >> { %v4289_v55 = vpop.f32.mrf.mxu0 }
 0x4e4   : >> { %v5423_v27 = vsel %vm588_vm1, %v2498_v13, -1e+30 }
 0x4e5   : >> { %v2294_v38 = vpop.f32.mrf.mxu0  ;;  %v2533_v19 = vsel %vm2520_vm12, %v5423_v27, -inf }
 0x4e6   : >> { %v2499_v29 = vmul.f32 0.35355338, %v2294_v38  ;;  %2534 = vmax.xlane.f32.xlu0 %v2533_v19 }
 0x4e7   : >> { %v4292_v40 = vpop.f32.mrf.mxu0 }
 0x4e8   : >> { %v5429_v30 = vsel %vm588_vm1, %v2499_v29, -1e+30 }
 0x4e9   : >> { %v2480_v59 = vpop.f32.mrf.mxu0  ;;  %v2536_v16 = vsel %vm2520_vm12, %v5429_v30, -inf }
 0x4ea   : >> { %v2503_v17 = vmul.f32 0.35355338, %v2480_v59  ;;  %2537 = vmax.xlane.f32.xlu0 %v2536_v16 }
 0x4eb   : >> { %v4316_v62 = vpop.f32.mrf.mxu0 }
 0x4ec   : >> { %v5435_v63 = vsel %vm588_vm1, %v2503_v17, -1e+30 }
 0x4ed   : >> { %v2485_v2 = vpop.f32.mrf.mxu0  ;;  %v2548_v42 = vsel %vm2520_vm12, %v5435_v63, -inf }
 0x4ee   : >> { %v2504_v11 = vmul.f32 0.35355338, %v2485_v2  ;;  %2549 = vmax.xlane.f32.xlu0 %v2548_v42 }
 0x4ef   : >> { %v4319_v14 = vpop.f32.mrf.mxu0 }
 0x4f0   : >> { %v5441_v33 = vsel %vm588_vm1, %v2504_v11, -1e+30 }
 0x4f1   : >> { %v2490_v35 = vpop.f32.mrf.mxu0  ;;  %v2551_v23 = vsel %vm2520_vm12, %v5441_v33, -inf }
 0x4f2   : >> { %v2505_v61 = vmul.f32 0.35355338, %v2490_v35  ;;  %2552 = vmax.xlane.f32.xlu0 %v2551_v23 }
 0x4f3   : >> { %1673 = vrot.lane.b32.xlu1 %v5046_v51, %s4734_s25  ;;  %v4322_v46 = vpop.f32.mrf.mxu0  ;;  %v2545_v51 = vsel %vm2520_vm12, %v5459_v34, -inf }
 0x4f4   : >> { %v5449_v9 = vsel %vm588_vm1, %v2505_v61, -1e+30 }
 0x4f5   : >> { %v2554_v20 = vsel %vm2520_vm12, %v5449_v9, -inf }
 0x4f6   : >> { %2555 = vmax.xlane.f32.xlu0 %v2554_v20 }
 0x50c   : >> { %1665 = vrot.lane.b32.xlu0 %v5042_v50, %s4734_s25  ;;  %v5479_v50 = vpop.permute.xlu0 %1667 }
 0x510   : >> { %1677 = vrot.lane.b32.xlu0 %v5052_v54, %s4734_s25 }
 0x514   : >> { %1657 = vrot.lane.b32.xlu0 %v5033_v48, %s4734_s25  ;;  %v5477_v48 = vpop.permute.xlu1 %1661 }
 0x517   : >> { %2546 = vmax.xlane.f32.xlu1 %v2545_v51 }
 0x518   : >> { %1675 = vrot.lane.b32.xlu0 %v5063_v58, %s4734_s25 }
 0x528   : >> { %1679 = vrot.lane.b32.xlu1 %v5049_v53, %s4734_s25 }
 0x52c   : >> { %1659 = vrot.lane.b32.xlu1 %v5029_v43, %s4734_s25 }
 0x530   : >> { %1671 = vrot.lane.b32.xlu1 %v5040_v49, %s4734_s25 }
 0x534   : >> { %1663 = vrot.lane.b32.xlu1 %v5059_v57, %s4734_s25 }
 0x538   : >> { %1669 = vrot.lane.b32.xlu1 %v5055_v56, %s4734_s25  ;;  %s3959_s25 = scalar_lea.sflag (%p591_p11), [#allocation3], %s6052_s19 }
 0x55f   : >> { %v2523_v54 = vpop.xlane.xlu1 %2522 }
 0x560   : >> { %v2557_v58 = vsub.f32 %v5387_v41, %v2523_v54 }
 0x562   : >> { %v2569_v53 = vmul.f32 1.442695, %v2557_v58 }
 0x563   : >> { %v2526_v47 = vpop.xlane.xlu0 %2525  ;;  %v2541_v39 = vpop.xlane.xlu1 %2540 }
 0x564   : >> { %4566 = vpow2.f32 %v2569_v53  ;;  %v2558_v43 = vsub.f32 %v5397_v12, %v2526_v47  ;;  %v2563_v56 = vsub.f32 %v5393_v21, %v2541_v39 }
 0x566   : >> { %v2571_v49 = vmul.f32 1.442695, %v2558_v43  ;;  %v2581_v13 = vmul.f32 1.442695, %v2563_v56 }
 0x567   : >> { %v2544_v45 = vpop.xlane.xlu1 %2543 }
 0x568   : >> { %4568 = vpow2.f32 %v2571_v49  ;;  %v2564_v57 = vsub.f32 %v5405_v22, %v2544_v45 }
 0x56a   : >> { %v2583_v44 = vmul.f32 1.442695, %v2564_v57 }
 0x56b   : >> { %v2532_v5 = vpop.xlane.xlu0 %2531  ;;  %v2529_v26 = vpop.xlane.xlu1 %2528 }
 0x56c   : >> { %4570 = vpow2.f32 %v2583_v44  ;;  %v2560_v18 = vsub.f32 %v5415_v37, %v2532_v5  ;;  %v2559_v41 = vsub.f32 %v5411_v10, %v2529_v26 }
 0x56e   : >> { %v2575_v60 = vmul.f32 1.442695, %v2560_v18  ;;  %v2573_v36 = vmul.f32 1.442695, %v2559_v41 }
 0x56f   : >> { %v2535_v55 = vpop.xlane.xlu0 %2534  ;;  %v1674_v45 = vpop.permute.xlu1 %1673 }
 0x570   : >> { %4572 = vpow2.f32 %v2575_v60  ;;  %v2561_v12 = vsub.f32 %v5423_v27, %v2535_v55  ;;  %v1829_v5 = vcombine.low %v5477_v48, %v1674_v45  ;;  %v1830_v26 = vcombine.high %v5477_v48, %v1674_v45 }
 0x571   : >> { %v5488_v38 = vpop.eup %4566  ;;  %4574 = vpow2.f32 %v2573_v36 }
 0x572   : >> { %v2577_v22 = vmul.f32 1.442695, %v2561_v12  ;;  %v2593_v21 = vsel %vm2520_vm12, %v5488_v38, 0.0  ;;  %4576 = vpow2.f32 %v2581_v13  ;;  %v1837_v55 = vrot.slane %v1829_v5, %v5069_v8 }
 0x573   : >> { %v2538_v19 = vpop.xlane.xlu0 %2537  ;;  %2594 = vadd.xlane.f32.xlu1 %v2593_v21  ;;  %v1844_v12 = vrot.slane %v1830_v26, %v5069_v8 }
 0x574   : >> { %4578 = vpow2.f32 %v2577_v22  ;;  %v2562_v10 = vsub.f32 %v5429_v30, %v2538_v19 }
 0x575   : >> { %v5493_v37 = vpop.eup %4568 }
 0x576   : >> { %v2579_v29 = vmul.f32 1.442695, %v2562_v10  ;;  %v2596_v40 = vsel %vm2520_vm12, %v5493_v37, 0.0 }
 0x577   : >> { %v2550_v27 = vpop.xlane.xlu0 %2549  ;;  %2597 = vadd.xlane.f32.xlu1 %v2596_v40 }
 0x578   : >> { %4580 = vpow2.f32 %v2579_v29  ;;  %v2566_v59 = vsub.f32 %v5435_v63, %v2550_v27 }
 0x579   : >> { %v5498_v16 = vpop.eup %4570 }
 0x57a   : >> { %v2587_v17 = vmul.f32 1.442695, %v2566_v59  ;;  %v2614_v62 = vsel %vm2520_vm12, %v5498_v16, 0.0 }
 0x57b   : >> { %v2553_v2 = vpop.xlane.xlu0 %2552  ;;  %2615 = vadd.xlane.f32.xlu0 %v2614_v62 }
 0x57c   : >> { %4582 = vpow2.f32 %v2587_v17  ;;  %v2567_v30 = vsub.f32 %v5441_v33, %v2553_v2 }
 0x57d   : >> { %v5503_v42 = vpop.eup %4572 }
 0x57e   : >> { %v5505_v11 = vpop.eup %4574  ;;  %v2589_v14 = vmul.f32 1.442695, %v2567_v30  ;;  %v2602_v35 = vsel %vm2520_vm12, %v5503_v42, 0.0 }
 0x57f   : >> { %v2556_v63 = vpop.xlane.xlu0 %2555  ;;  %2603 = vadd.xlane.f32.xlu0 %v2602_v35  ;;  %v2599_v23 = vsel %vm2520_vm12, %v5505_v11, 0.0  ;;  %v5511_v61 = vpop.eup %4576 }
 0x580   : >> { %4584 = vpow2.f32 %v2589_v14  ;;  %v2568_v46 = vsub.f32 %v5449_v9, %v2556_v63  ;;  %2600 = vadd.xlane.f32.xlu1 %v2599_v23  ;;  %v2611_v51 = vsel %vm2520_vm12, %v5511_v61, 0.0 }
 0x581   : >> { %v5514_v33 = vpop.eup %4578 }
 0x582   : >> { %v2591_v20 = vmul.f32 1.442695, %v2568_v46  ;;  %v2605_v24 = vsel %vm2520_vm12, %v5514_v33, 0.0 }
 0x583   : >> { %2606 = vadd.xlane.f32.xlu0 %v2605_v24  ;;  %v1666_v57 = vpop.permute.xlu0 %1665 }
 0x584   : >> { %4586 = vpow2.f32 %v2591_v20  ;;  %2612 = vadd.xlane.f32.xlu1 %v2611_v51 }
 0x585   : >> { %v5520_v54 = vpop.eup %4580 }
 0x586   : >> { %v2608_v58 = vsel %vm2520_vm12, %v5520_v54, 0.0 }
 0x587   : >> { %2609 = vadd.xlane.f32.xlu0 %v2608_v58  ;;  %v1678_v41 = vpop.permute.xlu0 %1677 }
 0x588   : >> { %v1777_v62 = vcombine.low %v1666_v57, %v1678_v41  ;;  %v1778_v2 = vcombine.high %v1666_v57, %v1678_v41 }
 0x589   : >> { %v5524_v9 = vpop.eup %4582 }
 0x58a   : >> { %v2620_v53 = vsel %vm2520_vm12, %v5524_v9, 0.0 }
 0x58b   : >> { %2621 = vadd.xlane.f32.xlu0 %v2620_v53  ;;  %v1658_v40 = vpop.permute.xlu0 %1657 }
 0x58d   : >> { %v5528_v47 = vpop.eup %4584 }
 0x58e   : >> { %v2623_v39 = vsel %vm2520_vm12, %v5528_v47, 0.0 }
 0x58f   : >> { %2624 = vadd.xlane.f32.xlu0 %v2623_v39  ;;  %v1785_v39 = vrot.slane %v1777_v62, %v5069_v8  ;;  %v1676_v45 = vpop.permute.xlu0 %1675 }
 0x591   : >> { %v5532_v43 = vpop.eup %4586 }
 0x592   : >> { %v2626_v49 = vsel %vm2520_vm12, %v5532_v43, 0.0 }
 0x593   : >> { %2627 = vadd.xlane.f32.xlu0 %v2626_v49  ;;  %v1792_v49 = vrot.slane %v1778_v2, %v5069_v8 }
 0x5a0   : >> { %v2547_v44 = vpop.xlane.xlu1 %2546 }
 0x5a1   : >> { %v2565_v56 = vsub.f32 %v5459_v34, %v2547_v44 }
 0x5a3   : >> { %v2585_v18 = vmul.f32 1.442695, %v2565_v56 }
 0x5a4   : >> { %v1680_v60 = vpop.permute.xlu1 %1679 }
 0x5a5   : >> { %4588 = vpow2.f32 %v2585_v18  ;;  %v1845_v36 = vcombine.low %v5479_v50, %v1680_v60  ;;  %v1846_v13 = vcombine.high %v5479_v50, %v1680_v60 }
 0x5a7   : >> { %v1853_v22 = vrot.slane %v1845_v36, %v5069_v8  ;;  %v1860_v34 = vrot.slane %v1846_v13, %v5069_v8 }
 0x5a8   : >> { %v1660_v21 = vpop.permute.xlu1 %1659 }
 0x5a9   : >> { %v1861_v19 = vcombine.low %v1837_v55, %v1853_v22  ;;  %v1862_v10 = vcombine.high %v1837_v55, %v1853_v22  ;;  %v1877_v48 = vcombine.low %v1844_v12, %v1860_v34  ;;  %v1878_v29 = vcombine.high %v1844_v12, %v1860_v34 }
 0x5ab   : >> { %v1869_v27 = vrot.slane %v1861_v19, %v5089_v25  ;;  %v1876_v59 = vrot.slane %v1862_v10, %v5089_v25  ;;  %v1885_v50 = vrot.slane %v1877_v48, %v5089_v25  ;;  %v1892_v17 = vrot.slane %v1878_v29, %v5089_v25 }
 0x5ac   : >> { %v1672_v30 = vpop.permute.xlu1 %1671 }
 0x5ad   : >> { %v2033_v14 = vcombine.low %v1869_v27, %v1876_v59  ;;  %v4071_v35 = vcombine.high %v1869_v27, %v1876_v59  ;;  %v2049_v63 = vcombine.low %v1885_v50, %v1892_v17  ;;  %v4072_v23 = vcombine.high %v1885_v50, %v1892_v17 }
 0x5ae   : >> { %v1761_v46 = vcombine.low %v1660_v21, %v1672_v30  ;;  %v1762_v20 = vcombine.high %v1660_v21, %v1672_v30 }
 0x5af   : >> { %v2040_v24 = vrot.slane %v2033_v14, %v5069_v8  ;;  %v2048_v51 = vrot.slane %v4071_v35, %v5069_v8  ;;  %v5552_v58 = vrot.slane %v2049_v63, %v5069_v8  ;;  %v5555_v53 = vrot.slane %v4072_v23, %v5069_v8 }
 0x5b0   : >> { %v1769_v57 = vrot.slane %v1761_v46, %v5069_v8  ;;  %v1776_v44 = vrot.slane %v1762_v20, %v5069_v8  ;;  %v1664_v56 = vpop.permute.xlu1 %1663 }
 0x5b1   : >> { %v1709_v5 = vcombine.low %v1664_v56, %v1676_v45  ;;  %v1710_v26 = vcombine.high %v1664_v56, %v1676_v45  ;;  %v2065_v18 = vcombine.low %v2040_v24, %v2048_v51  ;;  %v2081_v41 = vcombine.low %v5552_v58, %v5555_v53 }
 0x5b2   : >> { %v5563_v60 = vpop.eup %4588  ;;  %v1793_v36 = vcombine.low %v1769_v57, %v1785_v39  ;;  %v1794_v13 = vcombine.high %v1769_v57, %v1785_v39  ;;  %v1809_v55 = vcombine.low %v1776_v44, %v1792_v49  ;;  %v1810_v12 = vcombine.high %v1776_v44, %v1792_v49 }
 0x5b3   : >> { %v1717_v22 = vrot.slane %v1709_v5, %v5069_v8  ;;  %v1724_v34 = vrot.slane %v1710_v26, %v5069_v8  ;;  %v2617_v21 = vsel %vm2520_vm12, %v5563_v60, 0.0  ;;  %v2073_v19 = vrot.slane %v2065_v18, %v5089_v25 }
 0x5b4   : >> { %v1801_v10 = vrot.slane %v1793_v36, %v5089_v25  ;;  %v1808_v48 = vrot.slane %v1794_v13, %v5089_v25  ;;  %v1817_v29 = vrot.slane %v1809_v55, %v5089_v25  ;;  %v1824_v27 = vrot.slane %v1810_v12, %v5089_v25  ;;  %2618 = vadd.xlane.f32.xlu1 %v2617_v21  ;;  %v1670_v59 = vpop.permute.xlu1 %1669 }
 0x5b5   : >> { %v1693_v50 = vcombine.low %v1658_v40, %v1670_v59  ;;  %v1694_v17 = vcombine.high %v1658_v40, %v1670_v59  ;;  %v2089_v62 = vrot.slane %v2081_v41, %v5089_v25  ;;  %v2066_v2 = vcombine.high %v2040_v24, %v2048_v51 }
 0x5b6   : >> { %v1965_v30 = vcombine.low %v1801_v10, %v1808_v48  ;;  %v4069_v14 = vcombine.high %v1801_v10, %v1808_v48  ;;  %v1981_v35 = vcombine.low %v1817_v29, %v1824_v27  ;;  %v4070_v63 = vcombine.high %v1817_v29, %v1824_v27 }
 0x5b7   : >> { %v1701_v23 = vrot.slane %v1693_v50, %v5069_v8  ;;  %v1708_v46 = vrot.slane %v1694_v17, %v5069_v8  ;;  %v2097_v20 = vcombine.low %v2073_v19, %v2089_v62  ;;  %v2098_v39 = vcombine.high %v2073_v19, %v2089_v62 }
 0x5b8   : >> { %v1972_v49 = vrot.slane %v1965_v30, %v5069_v8  ;;  %v1980_v45 = vrot.slane %v4069_v14, %v5069_v8  ;;  %v1988_v57 = vrot.slane %v1981_v35, %v5069_v8  ;;  %v1996_v40 = vrot.slane %v4070_v63, %v5069_v8 }
 0x5b9   : >> { %v1725_v44 = vcombine.low %v1701_v23, %v1717_v22  ;;  %v1726_v24 = vcombine.high %v1701_v23, %v1717_v22  ;;  %v1741_v51 = vcombine.low %v1708_v46, %v1724_v34  ;;  %v1742_v56 = vcombine.high %v1708_v46, %v1724_v34  ;;  %4324 = vmatpush3.msra.mxu1 %v2097_v20 }
 0x5ba   : >> { %4339 = vmatpush3.msra.mxu0 %v2098_v39  ;;  %4325 = vmatprep.subr.mxu1 %v4728_v52  ;;  %v1997_v5 = vcombine.low %v1972_v49, %v1980_v45  ;;  %v2013_v26 = vcombine.low %v1988_v57, %v1996_v40  ;;  %v5583_v18 = vrot.slane %v2066_v2, %v5089_v25 }
 0x5bb   : >> { %v1733_v41 = vrot.slane %v1725_v44, %v5089_v25  ;;  %v1740_v36 = vrot.slane %v1726_v24, %v5089_v25  ;;  %v1749_v13 = vrot.slane %v1741_v51, %v5089_v25  ;;  %v1756_v55 = vrot.slane %v1742_v56, %v5089_v25  ;;  %4340 = vmatprep.subr.mxu0 %v4728_v52 }
 0x5bc   : >> { %v2005_v12 = vrot.slane %v1997_v5, %v5089_v25  ;;  %v2021_v22 = vrot.slane %v2013_v26, %v5089_v25  ;;  %v2082_v34 = vcombine.high %v5552_v58, %v5555_v53  ;;  %v1998_v21 = vcombine.high %v1972_v49, %v1980_v45 }
 0x5bd   : >> { %v1897_v19 = vcombine.low %v1733_v41, %v1740_v36  ;;  %v4067_v10 = vcombine.high %v1733_v41, %v1740_v36  ;;  %v1913_v48 = vcombine.low %v1749_v13, %v1756_v55  ;;  %v4068_v29 = vcombine.high %v1749_v13, %v1756_v55 }
 0x5be   : >> { %v2029_v27 = vcombine.low %v2005_v12, %v2021_v22  ;;  %v2030_v59 = vcombine.high %v2005_v12, %v2021_v22  ;;  %v5595_v50 = vrot.slane %v2082_v34, %v5089_v25  ;;  %v5598_v17 = vrot.slane %v1998_v21, %v5089_v25 }
 0x5bf   : >> { %v1904_v62 = vrot.slane %v1897_v19, %v5069_v8  ;;  %v1912_v2 = vrot.slane %v4067_v10, %v5069_v8  ;;  %v1920_v30 = vrot.slane %v1913_v48, %v5069_v8  ;;  %v1928_v58 = vrot.slane %v4068_v29, %v5069_v8 }
 0x5c0   : >> { %4326 = vmatpush3.msra.mxu1 %v2029_v27  ;;  %4341 = vmatpush3.msra.mxu0 %v2030_v59  ;;  %v2099_v53 = vcombine.low %v5583_v18, %v5595_v50  ;;  %v2014_v14 = vcombine.high %v1988_v57, %v1996_v40  ;;  %v2100_v35 = vcombine.high %v5583_v18, %v5595_v50 }
 0x5c1   : >> { %4327 = vmatprep.subr.mxu1 %v4728_v52  ;;  %4342 = vmatprep.subr.mxu0 %v4728_v52  ;;  %v1929_v63 = vcombine.low %v1904_v62, %v1912_v2  ;;  %v1945_v23 = vcombine.low %v1920_v30, %v1928_v58  ;;  %v1930_v46 = vcombine.high %v1904_v62, %v1912_v2 }
 0x5c2   : >> { %v5611_v20 = vrot.slane %v2014_v14, %v5089_v25  ;;  %v1946_v39 = vcombine.high %v1920_v30, %v1928_v58 }
 0x5c3   : >> { %v1937_v49 = vrot.slane %v1929_v63, %v5089_v25  ;;  %v1953_v45 = vrot.slane %v1945_v23, %v5089_v25  ;;  %v5616_v57 = vrot.slane %v1930_v46, %v5089_v25 }
 0x5c4   : >> { %v2031_v40 = vcombine.low %v5598_v17, %v5611_v20  ;;  %v5621_v44 = vrot.slane %v1946_v39, %v5089_v25  ;;  %v2032_v24 = vcombine.high %v5598_v17, %v5611_v20 }
 0x5c5   : >> { %v1961_v51 = vcombine.low %v1937_v49, %v1953_v45  ;;  %v1962_v56 = vcombine.high %v1937_v49, %v1953_v45 }
 0x5c6   : >> { %v1963_v5 = vcombine.low %v5616_v57, %v5621_v44  ;;  %v1964_v26 = vcombine.high %v5616_v57, %v5621_v44 }
 0x5c7   : >> { %4328 = vmatpush3.msra.mxu1 %v1961_v51  ;;  %4343 = vmatpush3.msra.mxu0 %v1962_v56 }
 0x5c8   : >> { %4353 = vmatprep.subr.mxu1 %v4728_v52  ;;  %4368 = vmatprep.subr.mxu0 %v4728_v52 }
 0x5fc   : >> { %v2595_v41 = vpop.xlane.xlu1 %2594 }
 0x5fd   : >> { %4590 = vrcp.f32 %v2595_v41 }
 0x600   : >> { %v2598_v36 = vpop.xlane.xlu1 %2597 }
 0x601   : >> { %4592 = vrcp.f32 %v2598_v36 }
 0x604   : >> { %v2616_v13 = vpop.xlane.xlu0 %2615 }
 0x608   : >> { %v2604_v55 = vpop.xlane.xlu0 %2603 }
 0x609   : >> { %4594 = vrcp.f32 %v2604_v55  ;;  %v2601_v12 = vpop.xlane.xlu1 %2600 }
 0x60a   : >> { %v4591_v22 = vpop.eup %4590  ;;  %4596 = vrcp.f32 %v2601_v12 }
 0x60b   : >> { %v2641_v34 = vmul.f32 %v4591_v22, %v5488_v38 }
 0x60c   : >> { %v2607_v21 = vpop.xlane.xlu0 %2606 }
 0x60d   : >> { %4598 = vrcp.f32 %v2607_v21  ;;  %v2613_v19 = vpop.xlane.xlu1 %2612  ;;  %4330 = vmatmul.mubr.msk.f32.vlgmr.msra.gmra.mxu1 %vm2520_vm12, %v2641_v34 }
 0x60e   : >> { %v4593_v10 = vpop.eup %4592  ;;  %4600 = vrcp.f32 %v2613_v19  ;;  %4354 = vmatpush3.msra.mxu1 %v2099_v53  ;;  %4332 = vmatprep.mubr.msk.f32.mxu1 %vm4729_vm4, %v4728_v52 }
 0x60f   : >> { %4355 = vmatprep.subr.mxu1 %v4728_v52  ;;  %v2642_v48 = vmul.f32 %v4593_v10, %v5493_v37  ;;  %4602 = vrcp.f32 %v2616_v13 }
 0x610   : >> { %4356 = vmatpush3.msra.mxu1 %v2031_v40  ;;  %v2610_v29 = vpop.xlane.xlu0 %2609 }
 0x611   : >> { %4604 = vrcp.f32 %v2610_v29  ;;  %4357 = vmatprep.subr.mxu1 %v4728_v52  ;;  %4333 = vmatmul.mubr.msk.f32.gmra.mxu1 %vm2520_vm12, %v2642_v48 }
 0x612   : >> { %4358 = vmatpush3.msra.mxu1 %v1963_v5  ;;  %4335 = vmatprep.mubr.msk.f32.mxu1 %vm4729_vm4, %v4728_v52 }
 0x613   : >> { %4383 = vmatprep.subr.mxu1 %v4728_v52 }
 0x614   : >> { %v2622_v38 = vpop.xlane.xlu0 %2621 }
 0x615   : >> { %4606 = vrcp.f32 %v2622_v38 }
 0x616   : >> { %v4595_v27 = vpop.eup %4594 }
 0x617   : >> { %v4597_v59 = vpop.eup %4596  ;;  %v2644_v37 = vmul.f32 %v4595_v27, %v5503_v42 }
 0x618   : >> { %v2625_v17 = vpop.xlane.xlu0 %2624  ;;  %v2643_v62 = vmul.f32 %v4597_v59, %v5505_v11 }
 0x619   : >> { %4608 = vrcp.f32 %v2625_v17  ;;  %4345 = vmatmul.mubr.msk.f32.vlgmr.msra.gmra.mxu0 %vm2520_vm12, %v2644_v37 }
 0x61a   : >> { %v4599_v2 = vpop.eup %4598  ;;  %4336 = vmatmul.mubr.msk.f32.gmra.mxu1 %vm2520_vm12, %v2643_v62  ;;  %4369 = vmatpush3.msra.mxu0 %v2100_v35 }
 0x61b   : >> { %v4601_v30 = vpop.eup %4600  ;;  %4370 = vmatprep.subr.mxu0 %v4728_v52  ;;  %4347 = vmatprep.mubr.msk.f32.mxu0 %vm4729_vm4, %v4728_v52  ;;  %v2645_v42 = vmul.f32 %v4599_v2, %v5514_v33 }
 0x61c   : >> { %v2647_v11 = vmul.f32 %v4601_v30, %v5511_v61  ;;  %4371 = vmatpush3.msra.mxu0 %v2032_v24  ;;  %v2628_v58 = vpop.xlane.xlu0 %2627  ;;  %4359 = vmatprep.mubr.msk.f32.mxu1 %vm4729_vm4, %v4728_v52  ;;  %v4603_v53 = vpop.eup %4602 }
 0x61d   : >> { %4610 = vrcp.f32 %v2628_v58  ;;  %4372 = vmatprep.subr.mxu0 %v4728_v52  ;;  %4348 = vmatmul.mubr.msk.f32.gmra.mxu0 %vm2520_vm12, %v2645_v42  ;;  %v2648_v33 = vmul.f32 %v4603_v53, %v5498_v16 }
 0x61e   : >> { %v4605_v18 = vpop.eup %4604  ;;  %4360 = vmatmul.mubr.msk.f32.vlgmr.msra.gmra.mxu1 %vm2520_vm12, %v2647_v11  ;;  %4373 = vmatpush3.msra.mxu0 %v1964_v26 }
 0x61f   : >> { %4350 = vmatprep.mubr.msk.f32.mxu0 %vm4729_vm4, %v4728_v52  ;;  %4362 = vmatprep.mubr.msk.f32.mxu1 %vm4729_vm4, %v4728_v52  ;;  %v2646_v61 = vmul.f32 %v4605_v18, %v5520_v54 }
 0x620   : >> { %4400 = vmatprep.subr.mxu0 %v4728_v52 }
 0x621   : >> { %4351 = vmatmul.mubr.msk.f32.gmra.mxu0 %vm2520_vm12, %v2646_v61 }
 0x622   : >> { %v4607_v50 = vpop.eup %4606  ;;  %4363 = vmatmul.mubr.msk.f32.gmra.mxu1 %vm2520_vm12, %v2648_v33  ;;  %4374 = vmatprep.mubr.msk.f32.mxu0 %vm4729_vm4, %v4728_v52 }
 0x623   : >> { %v2650_v14 = vmul.f32 %v4607_v50, %v5524_v9  ;;  %4365 = vmatprep.mubr.msk.f32.mxu1 %vm4729_vm4, %v4728_v52 }
 0x625   : >> { %4375 = vmatmul.mubr.msk.f32.vlgmr.msra.gmra.mxu0 %vm2520_vm12, %v2650_v14 }
 0x626   : >> { %v4609_v54 = vpop.eup %4608  ;;  %4377 = vmatprep.mubr.msk.f32.mxu0 %vm4729_vm4, %v4728_v52 }
 0x627   : >> { %v2651_v16 = vmul.f32 %v4609_v54, %v5528_v47  ;;  %v3466_v47 = vld [vmem:[%s6029_s6 + $0x18] sm:$0xff] }
 0x628   : >> { %4384 = vmatpush3.msra.mxu1 %v3466_v47 }
 0x629   : >> { %4378 = vmatmul.mubr.msk.f32.gmra.mxu0 %vm2520_vm12, %v2651_v16  ;;  %4385 = vmatprep.subr.mxu1 %v4728_v52 }
 0x62a   : >> { %v4611_v35 = vpop.eup %4610  ;;  %4380 = vmatprep.mubr.msk.f32.mxu0 %vm4729_vm4, %v4728_v52 }
 0x62b   : >> { %v2652_v63 = vmul.f32 %v4611_v35, %v5532_v43  ;;  %v3465_v35 = vld [vmem:[%s6029_s6 + $0x10] sm:$0xff] }
 0x62c   : >> { %4386 = vmatpush3.msra.mxu1 %v3465_v35 }
 0x62d   : >> { %4381 = vmatmul.mubr.msk.f32.gmra.mxu0 %vm2520_vm12, %v2652_v63  ;;  %v3464_v63 = vld [vmem:[%s6029_s6 + $0x8] sm:$0xff]  ;;  %4387 = vmatprep.subr.mxu1 %v4728_v52 }
 0x62e   : >> { %4408 = vmatprep.mubr.msk.f32.mxu0 %vm4729_vm4, %v4728_v52  ;;  %4388 = vmatpush3.msra.mxu1 %v3464_v63 }
 0x62f   : >> { %4389 = vmatprep.subr.mxu1 %v4728_v52 }
 0x63d   : >> { %v2619_v9 = vpop.xlane.xlu1 %2618 }
 0x63e   : >> { %4612 = vrcp.f32 %v2619_v9 }
 0x64b   : >> { %v4613_v23 = vpop.eup %4612 }
 0x64c   : >> { %v2649_v46 = vmul.f32 %v4613_v23, %v5563_v60 }
 0x64e   : >> { %4366 = vmatmul.mubr.msk.f32.gmra.mxu1 %vm2520_vm12, %v2649_v46 }
 0x64f   : >> { %4391 = vmatprep.mubr.msk.f32.mxu1 %vm4729_vm4, %v4728_v52 }
 0x6cd   : >> { %v2728_v43 = vpop.f32.mrf.mxu1 }
 0x6cf   : >> { %v4331_v20 = vpop.f32.mrf.mxu1 }
 0x6d1   : >> { %v2733_v39 = vpop.f32.mrf.mxu1 }
 0x6d3   : >> { %v4334_v49 = vpop.f32.mrf.mxu1 }
 0x6d9   : >> { %v2817_v45 = vpop.f32.mrf.mxu0 }
 0x6da   : >> { %v5692_v57 = vpop.f32.mrf.mxu1 }
 0x6db   : >> { %v4346_v60 = vpop.f32.mrf.mxu0 }
 0x6dc   : >> { %v4337_v40 = vpop.f32.mrf.mxu1 }
 0x6dd   : >> { %v2822_v44 = vpop.f32.mrf.mxu0 }
 0x6de   : >> { %v2906_v24 = vpop.f32.mrf.mxu1 }
 0x6df   : >> { %v4349_v51 = vpop.f32.mrf.mxu0  ;;  %v3009_v36 = vcombine.low %v2728_v43, %v2906_v24  ;;  %v3010_v13 = vcombine.high %v2728_v43, %v2906_v24 }
 0x6e0   : >> { %v4361_v56 = vpop.f32.mrf.mxu1 }
 0x6e1   : >> { %v5694_v5 = vpop.f32.mrf.mxu0  ;;  %v3017_v19 = vrot.slane %v3009_v36, %v5069_v8  ;;  %v3024_v10 = vrot.slane %v3010_v13, %v5069_v8 }
 0x6e2   : >> { %v2911_v26 = vpop.f32.mrf.mxu1 }
 0x6e3   : >> { %v4352_v41 = vpop.f32.mrf.mxu0  ;;  %v3077_v38 = vcombine.low %v2733_v39, %v2911_v26  ;;  %v3078_v27 = vcombine.high %v2733_v39, %v2911_v26  ;;  %v3463_v26 = vld [vmem:[%s6029_s6] sm:$0xff] }
 0x6e4   : >> { %v4364_v55 = vpop.f32.mrf.mxu1  ;;  %4390 = vmatpush3.msra.mxu1 %v3463_v26 }
 0x6e5   : >> { %v2995_v12 = vpop.f32.mrf.mxu0  ;;  %v3085_v33 = vrot.slane %v3077_v38, %v5069_v8  ;;  %v3092_v50 = vrot.slane %v3078_v27, %v5069_v8  ;;  %4417 = vmatprep.subr.mxu1 %v4728_v52 }
 0x6e6   : >> { %v3025_v22 = vcombine.low %v2817_v45, %v2995_v12  ;;  %v3026_v34 = vcombine.high %v2817_v45, %v2995_v12 }
 0x6e7   : >> { %v4376_v21 = vpop.f32.mrf.mxu0 }
 0x6e8   : >> { %v3033_v48 = vrot.slane %v3025_v22, %v5069_v8  ;;  %v3040_v29 = vrot.slane %v3026_v34, %v5069_v8 }
 0x6e9   : >> { %v3000_v59 = vpop.f32.mrf.mxu0 }
 0x6ea   : >> { %v3041_v37 = vcombine.low %v3017_v19, %v3033_v48  ;;  %v3042_v17 = vcombine.high %v3017_v19, %v3033_v48  ;;  %v3057_v62 = vcombine.low %v3024_v10, %v3040_v29  ;;  %v3058_v2 = vcombine.high %v3024_v10, %v3040_v29 }
 0x6eb   : >> { %v3093_v30 = vcombine.low %v2822_v44, %v3000_v59  ;;  %v3094_v42 = vcombine.high %v2822_v44, %v3000_v59  ;;  %v4379_v11 = vpop.f32.mrf.mxu0 }
 0x6ec   : >> { %v3049_v58 = vrot.slane %v3041_v37, %v5089_v25  ;;  %v3056_v53 = vrot.slane %v3042_v17, %v5089_v25  ;;  %v3065_v18 = vrot.slane %v3057_v62, %v5089_v25  ;;  %v3072_v61 = vrot.slane %v3058_v2, %v5089_v25 }
 0x6ed   : >> { %v3101_v14 = vrot.slane %v3093_v30, %v5069_v8  ;;  %v3108_v54 = vrot.slane %v3094_v42, %v5069_v8  ;;  %v5708_v16 = vpop.f32.mrf.mxu0 }
 0x6ee   : >> { %v3213_v9 = vcombine.low %v3049_v58, %v3056_v53  ;;  %v4109_v23 = vcombine.high %v3049_v58, %v3056_v53  ;;  %v3229_v46 = vcombine.low %v3065_v18, %v3072_v61  ;;  %v4110_v47 = vcombine.high %v3065_v18, %v3072_v61 }
 0x6ef   : >> { %v3109_v43 = vcombine.low %v3085_v33, %v3101_v14  ;;  %v3110_v20 = vcombine.high %v3085_v33, %v3101_v14  ;;  %v3125_v39 = vcombine.low %v3092_v50, %v3108_v54  ;;  %v3126_v49 = vcombine.high %v3092_v50, %v3108_v54  ;;  %v4382_v45 = vpop.f32.mrf.mxu0 }
 0x6f0   : >> { %v3220_v60 = vrot.slane %v3213_v9, %v5069_v8  ;;  %v3228_v40 = vrot.slane %v4109_v23, %v5069_v8  ;;  %v3236_v41 = vrot.slane %v3229_v46, %v5069_v8  ;;  %v3244_v36 = vrot.slane %v4110_v47, %v5069_v8 }
 0x6f1   : >> { %v3117_v44 = vrot.slane %v3109_v43, %v5089_v25  ;;  %v3124_v24 = vrot.slane %v3110_v20, %v5089_v25  ;;  %v3133_v51 = vrot.slane %v3125_v39, %v5089_v25  ;;  %v3140_v56 = vrot.slane %v3126_v49, %v5089_v25 }
 0x6f2   : >> { %v3246_v34 = vcombine.high %v3220_v60, %v3228_v40  ;;  %v3262_v21 = vcombine.high %v3236_v41, %v3244_v36  ;;  %v3245_v19 = vcombine.low %v3220_v60, %v3228_v40  ;;  %v3261_v10 = vcombine.low %v3236_v41, %v3244_v36 }
 0x6f3   : >> { %v3281_v13 = vcombine.low %v3117_v44, %v3124_v24  ;;  %v4111_v55 = vcombine.high %v3117_v44, %v3124_v24  ;;  %v3297_v12 = vcombine.low %v3133_v51, %v3140_v56  ;;  %v4112_v22 = vcombine.high %v3133_v51, %v3140_v56 }
 0x6f4   : >> { %v3260_v59 = vrot.slane %v3246_v34, %v5089_v25  ;;  %v3276_v37 = vrot.slane %v3262_v21, %v5089_v25  ;;  %v5737_v17 = vrot.slane %v3245_v19, %v5089_v25  ;;  %v5740_v62 = vrot.slane %v3261_v10, %v5089_v25 }
 0x6f5   : >> { %v3288_v48 = vrot.slane %v3281_v13, %v5069_v8  ;;  %v3296_v29 = vrot.slane %v4111_v55, %v5069_v8  ;;  %v3304_v38 = vrot.slane %v3297_v12, %v5069_v8  ;;  %v3312_v27 = vrot.slane %v4112_v22, %v5069_v8 }
 0x6f6   : >> { %v3279_v58 = vcombine.low %v3260_v59, %v3276_v37  ;;  %v3278_v53 = vcombine.high %v5737_v17, %v5740_v62  ;;  %v3277_v18 = vcombine.low %v5737_v17, %v5740_v62  ;;  %v3280_v63 = vcombine.high %v3260_v59, %v3276_v37 }
 0x6f7   : >> { %v3314_v2 = vcombine.high %v3288_v48, %v3296_v29  ;;  %v3330_v30 = vcombine.high %v3304_v38, %v3312_v27  ;;  %v3313_v42 = vcombine.low %v3288_v48, %v3296_v29  ;;  %v3329_v11 = vcombine.low %v3304_v38, %v3312_v27 }
 0x6f8   : >> { %3432 = vrot.lane.b32.xlu0 %v3279_v58, %s4737_s22  ;;  %3420 = vrot.lane.b32.xlu1 %v3278_v53, %s4738_s28  ;;  %v3161_v46 = vcombine.low %v5694_v5, %v5708_v16  ;;  %v3162_v47 = vcombine.high %v5694_v5, %v5708_v16 }
 0x6f9   : >> { %v3328_v61 = vrot.slane %v3314_v2, %v5089_v25  ;;  %v3344_v33 = vrot.slane %v3330_v30, %v5089_v25  ;;  %v5749_v50 = vrot.slane %v3313_v42, %v5089_v25  ;;  %v5752_v14 = vrot.slane %v3329_v11, %v5089_v25 }
 0x6fa   : >> { %v3169_v45 = vrot.slane %v3161_v46, %v5069_v8  ;;  %v3176_v60 = vrot.slane %v3162_v47, %v5069_v8 }
 0x6fb   : >> { %v3348_v54 = vcombine.high %v3328_v61, %v3344_v33  ;;  %v3345_v35 = vcombine.low %v5749_v50, %v5752_v14  ;;  %v3346_v9 = vcombine.high %v5749_v50, %v5752_v14  ;;  %v3347_v23 = vcombine.low %v3328_v61, %v3344_v33 }
 0x6fc   : >> { %3444 = vrot.lane.b32.xlu1 %v3280_v63, %s4739_s18 }
 0x6fd   : >> { %3446 = vrot.lane.b32.xlu0 %v3348_v54, %s4739_s18 }
 0x700   : >> { %3422 = vrot.lane.b32.xlu1 %v3346_v9, %s4738_s28 }
 0x704   : >> { %3434 = vrot.lane.b32.xlu1 %v3347_v23, %s4737_s22 }
 0x70e   : >> { %v2916_v43 = vpop.f32.mrf.mxu1 }
 0x70f   : >> { %v3145_v20 = vcombine.low %v5692_v57, %v2916_v43  ;;  %v3146_v39 = vcombine.high %v5692_v57, %v2916_v43 }
 0x710   : >> { %v4367_v49 = vpop.f32.mrf.mxu1 }
 0x711   : >> { %v3153_v40 = vrot.slane %v3145_v20, %v5069_v8  ;;  %v3160_v44 = vrot.slane %v3146_v39, %v5069_v8  ;;  %v4115_v20 = vld [vmem:[%s6030_s7] ss:$0 sm:$0xff] }
 0x713   : >> { %v3177_v24 = vcombine.low %v3153_v40, %v3169_v45  ;;  %v3178_v51 = vcombine.high %v3153_v40, %v3169_v45  ;;  %v3193_v56 = vcombine.low %v3160_v44, %v3176_v60  ;;  %v3194_v26 = vcombine.high %v3160_v44, %v3176_v60 }
 0x715   : >> { %v3185_v5 = vrot.slane %v3177_v24, %v5089_v25  ;;  %v3192_v16 = vrot.slane %v3178_v51, %v5089_v25  ;;  %v3201_v41 = vrot.slane %v3193_v56, %v5089_v25  ;;  %v3208_v57 = vrot.slane %v3194_v26, %v5089_v25 }
 0x717   : >> { %v3349_v36 = vcombine.low %v3185_v5, %v3192_v16  ;;  %v4113_v13 = vcombine.high %v3185_v5, %v3192_v16  ;;  %v3365_v55 = vcombine.low %v3201_v41, %v3208_v57  ;;  %v4114_v12 = vcombine.high %v3201_v41, %v3208_v57 }
 0x719   : >> { %v3356_v22 = vrot.slane %v3349_v36, %v5069_v8  ;;  %v3364_v34 = vrot.slane %v4113_v13, %v5069_v8  ;;  %v3372_v21 = vrot.slane %v3365_v55, %v5069_v8  ;;  %v3380_v19 = vrot.slane %v4114_v12, %v5069_v8 }
 0x71b   : >> { %v3382_v10 = vcombine.high %v3356_v22, %v3364_v34  ;;  %v3398_v48 = vcombine.high %v3372_v21, %v3380_v19  ;;  %v3381_v29 = vcombine.low %v3356_v22, %v3364_v34  ;;  %v3397_v38 = vcombine.low %v3372_v21, %v3380_v19 }
 0x71d   : >> { %v3396_v27 = vrot.slane %v3382_v10, %v5089_v25  ;;  %v3412_v59 = vrot.slane %v3398_v48, %v5089_v25  ;;  %v3389_v37 = vrot.slane %v3381_v29, %v5089_v25  ;;  %v3405_v2 = vrot.slane %v3397_v38, %v5089_v25 }
 0x71f   : >> { %v3415_v30 = vcombine.low %v3396_v27, %v3412_v59  ;;  %v3414_v42 = vcombine.high %v3389_v37, %v3405_v2  ;;  %v3413_v11 = vcombine.low %v3389_v37, %v3405_v2  ;;  %v3416_v8 = vcombine.high %v3396_v27, %v3412_v59  ;;  %v3643_v59 = vld [vmem:[%s6031_s8 + $0x18] sm:$0xff]  ;;  %v3642_v37 = vld [vmem:[%s6031_s8 + $0x10] sm:$0xff]  ;;  %v3641_v2 = vld [vmem:[%s6031_s8 + $0x8] sm:$0xff] }
 0x720   : >> { %4401 = vmatpush3.msra.mxu0 %v3643_v59  ;;  %v3757_v59 = vld [vmem:[%s6033_s10 + $0x10] sm:$0xff] }
 0x721   : >> { %3436 = vrot.lane.b32.xlu0 %v3415_v30, %s4737_s22  ;;  %3424 = vrot.lane.b32.xlu1 %v3414_v42, %s4738_s28  ;;  %v3640_v30 = vld [vmem:[%s6031_s8] sm:$0xff]  ;;  %v3770_v42 = vld [vmem:[%s6033_s10 + $0x78] sm:$0xff]  ;;  %s4742_s22 = smov (%p591_p11), [#allocation2]  }
 0x722   : >> { %4402 = vmatprep.subr.mxu0 %v4728_v52 }
 0x723   : >> { %4403 = vmatpush3.msra.mxu0 %v3642_v37  ;;  %v3756_v37 = vld [vmem:[%s6033_s10 + $0x8] sm:$0xff] }
 0x724   : >> { %4404 = vmatprep.subr.mxu0 %v4728_v52 }
 0x725   : >> { %3448 = vrot.lane.b32.xlu1 %v3416_v8, %s4739_s18  ;;  %4405 = vmatpush3.msra.mxu0 %v3641_v2  ;;  %v3768_v8 = vld [vmem:[%s6033_s10 + $0x68] sm:$0xff]  ;;  %v3755_v2 = vld [vmem:[%s6033_s10] sm:$0xff]  ;;  %s4127_s18 = sshll.u32 (%p591_p11), %s4839_s17, 4  ;;  %s4638_s17 = sshll.u32 (%p591_p11), %s4742_s22, 4  ;;  %s4639_s17 = int_to_ptr.vmem [resolvable:$false] %s4638_s17 }
 0x726   : >> { %4406 = vmatprep.subr.mxu0 %v4728_v52  ;;  %s5985_s15 = scalar_lea.hbm (%p591_p11), %s6037_s14, %s4127_s18  ;;  %s4640_s28 = scalar_lea.vmem (%p591_p11), %s4639_s17, 32 }
 0x727   : >> { %4407 = vmatpush3.msra.mxu0 %v3640_v30  ;;  %v4121_v30 = vld [vmem:[%s6032_s9] ss:$0 sm:$0xff]  ;;  %p4641_p1 = scmp.lt.s32.totalorder (%p591_p11), %s3972_s20, %s4639_s17  ;;  %p4642_p2 = scmp.lt.s32.totalorder (%p591_p11), %s4640_s28, %s4634_s0 }
 0x729   : > { %p4643_p3 = por (%p591_p11), %p4642_p2, %p4641_p1 }
 0x72b   : > { %p4644_p4 = pnand (%p591_p11), %p4643_p3, %p4637_p0 }
 0x76a   : >> { %v3421_v58 = vpop.permute.xlu1 %3420  ;;  %v3433_v53 = vpop.permute.xlu0 %3432 }
 0x76b   : >> { %v3453_v61 = vsel %vm2101_vm11, %v3277_v18, %v3421_v58  ;;  %v3767_v58 = vld [vmem:[%s6033_s10 + $0x60] sm:$0xff] }
 0x76c   : >> { %v3457_v25 = vsel %vm3456_vm13, %v3453_v61, %v3433_v53 }
 0x76e   : >> { %v3445_v33 = vpop.permute.xlu1 %3444 }
 0x76f   : >> { %v3460_v50 = vsel %vm2520_vm12, %v3457_v25, %v3445_v33  ;;  %v3447_v9 = vpop.permute.xlu0 %3446 }
 0x770   : >> { %4392 = vmatmul.mubr.msk.f32.vlgmr.msra.gmra.mxu1 %vm598_vm3, %v3460_v50 }
 0x771   : >> { %4394 = vmatprep.mubr.msk.f32.mxu1 %vm4729_vm4, %v4728_v52  ;;  %4418 = vmatpush3.msra.mxu1 %v3770_v42 }
 0x772   : >> { %v3423_v14 = vpop.permute.xlu1 %3422  ;;  %4419 = vmatprep.subr.mxu1 %v4728_v52 }
 0x773   : >> { %v3454_v54 = vsel %vm2101_vm11, %v3345_v35, %v3423_v14 }
 0x776   : >> { %v3435_v63 = vpop.permute.xlu1 %3434 }
 0x777   : >> { %v3458_v17 = vsel %vm3456_vm13, %v3454_v54, %v3435_v63 }
 0x778   : >> { %v3461_v62 = vsel %vm2520_vm12, %v3458_v17, %v3447_v9 }
 0x779   : >> { %4395 = vmatmul.mubr.msk.f32.gmra.mxu1 %vm598_vm3, %v3461_v62 }
 0x77a   : >> { %4397 = vmatprep.mubr.msk.f32.mxu1 %vm4729_vm4, %v4728_v52 }
 0x793   : >> { %v3425_v18 = vpop.permute.xlu1 %3424  ;;  %v3437_v23 = vpop.permute.xlu0 %3436 }
 0x794   : >> { %v3455_v46 = vsel %vm2101_vm11, %v3413_v11, %v3425_v18  ;;  %v3769_v11 = vld [vmem:[%s6033_s10 + $0x70] sm:$0xff] }
 0x795   : >> { %v3459_v47 = vsel %vm3456_vm13, %v3455_v46, %v3437_v23  ;;  %4420 = vmatpush3.msra.mxu1 %v3769_v11 }
 0x796   : >> { %4421 = vmatprep.subr.mxu1 %v4728_v52 }
 0x797   : >> { %v3449_v43 = vpop.permute.xlu1 %3448  ;;  %4422 = vmatpush3.msra.mxu1 %v3768_v8 }
 0x798   : >> { %v3462_v35 = vsel %vm2520_vm12, %v3459_v47, %v3449_v43  ;;  %4423 = vmatprep.subr.mxu1 %v4728_v52 }
 0x799   : >> { %4398 = vmatmul.mubr.msk.f32.gmra.mxu1 %vm598_vm3, %v3462_v35 }
 0x79a   : >> { %4449 = vmatprep.mubr.msk.f32.mxu1 %vm4729_vm4, %v4728_v52  ;;  %4424 = vmatpush3.msra.mxu1 %v3767_v58 }
 0x79b   : >> { %4425 = vmatprep.subr.mxu1 %v4728_v52 }
 0x830   : >> { %v3549_v39 = vpop.f32.mrf.mxu1 }
 0x831   : >> { %v3550_v49 = vadd.f32 %v4115_v20, %v3549_v39 }
 0x832   : >> { %v4393_v45 = vpop.f32.mrf.mxu1 }
 0x833   : >> { %v5814_v60 = vadd.f32 %v4722_v31, %v3550_v49 }
 0x835   : >> { %v3566_v40 = vsel %vm598_vm3, %v5814_v60, 0.0 }
 0x836   : >> { %3567 = vadd.xlane.f32.xlu0 %v3566_v40 }
 0x839   : >> { %v3554_v44 = vpop.f32.mrf.mxu1 }
 0x83a   : >> { %v3555_v24 = vadd.f32 %v4115_v20, %v3554_v44 }
 0x83b   : >> { %v4396_v51 = vpop.f32.mrf.mxu1 }
 0x83c   : >> { %v5819_v56 = vadd.f32 %v4718_v32, %v3555_v24 }
 0x83e   : >> { %v3569_v26 = vsel %vm598_vm3, %v5819_v56, 0.0 }
 0x83f   : >> { %3570 = vadd.xlane.f32.xlu1 %v3569_v26 }
 0x859   : >> { %v3559_v5 = vpop.f32.mrf.mxu1 }
 0x85a   : >> { %v3560_v16 = vadd.f32 %v4115_v20, %v3559_v5 }
 0x85b   : >> { %v4399_v41 = vpop.f32.mrf.mxu1 }
 0x85c   : >> { %v5824_v31 = vadd.f32 %v4714_v28, %v3560_v16 }
 0x85e   : >> { %v3572_v57 = vsel %vm598_vm3, %v5824_v31, 0.0 }
 0x85f   : >> { %3573 = vadd.xlane.f32.xlu0 %v3572_v57 }
 0x8bf   : >> { %v3568_v36 = vpop.xlane.xlu0 %3567 }
 0x8c0   : >> { %v3575_v13 = vmul.f32 0.03125, %v3568_v36 }
 0x8c2   : >> { %v5829_v55 = vsub.f32 %v5814_v60, %v3575_v13 }
 0x8c4   : >> { %v3581_v32 = vmul.f32 %v5829_v55, %v5829_v55  ;;  %v3600_v35 = vmul.f32 %v4883_v3, %v5829_v55 }
 0x8c6   : >> { %v3584_v12 = vsel %vm598_vm3, %v3581_v32, 0.0 }
 0x8c7   : >> { %3585 = vadd.xlane.f32.xlu0 %v3584_v12 }
 0x8c8   : >> { %v3571_v22 = vpop.xlane.xlu1 %3570 }
 0x8c9   : >> { %v3576_v34 = vmul.f32 0.03125, %v3571_v22 }
 0x8cb   : >> { %v5835_v28 = vsub.f32 %v5819_v56, %v3576_v34  ;;  %v3766_v34 = vld [vmem:[%s6033_s10 + $0x58] sm:$0xff] }
 0x8cc   : >> { %4426 = vmatpush3.msra.mxu1 %v3766_v34  ;;  %v3880_v34 = vld [vmem:[%s6035_s12 + $0x10] sm:$0xff] (%p591_p11) }
 0x8cd   : >> { %v3582_v21 = vmul.f32 %v5835_v28, %v5835_v28  ;;  %v3601_v44 = vmul.f32 %v4883_v3, %v5835_v28  ;;  %4427 = vmatprep.subr.mxu1 %v4728_v52  ;;  %v3765_v28 = vld [vmem:[%s6033_s10 + $0x50] sm:$0xff] }
 0x8ce   : >> { %4428 = vmatpush3.msra.mxu1 %v3765_v28 }
 0x8cf   : >> { %v3587_v19 = vsel %vm598_vm3, %v3582_v21, 0.0  ;;  %4429 = vmatprep.subr.mxu1 %v4728_v52  ;;  %v3764_v21 = vld [vmem:[%s6033_s10 + $0x48] sm:$0xff] }
 0x8d0   : >> { %3588 = vadd.xlane.f32.xlu0 %v3587_v19  ;;  %4430 = vmatpush3.msra.mxu1 %v3764_v21  ;;  %v3763_v19 = vld [vmem:[%s6033_s10 + $0x40] sm:$0xff] }
 0x8d1   : >> { %4431 = vmatprep.subr.mxu1 %v4728_v52 }
 0x8d2   : >> { %4432 = vmatpush3.msra.mxu1 %v3763_v19 }
 0x8d3   : >> { %4433 = vmatprep.subr.mxu1 %v4728_v52 }
 0x8e8   : >> { %v3574_v10 = vpop.xlane.xlu0 %3573 }
 0x8e9   : >> { %v3577_v48 = vmul.f32 0.03125, %v3574_v10  ;;  %v3762_v10 = vld [vmem:[%s6033_s10 + $0x38] sm:$0xff] }
 0x8ea   : >> { %4434 = vmatpush3.msra.mxu1 %v3762_v10  ;;  %v3882_v10 = vld [vmem:[%s6036_s13] sm:$0x1] (%p591_p11) }
 0x8eb   : >> { %v5841_v29 = vsub.f32 %v5824_v31, %v3577_v48  ;;  %4435 = vmatprep.subr.mxu1 %v4728_v52  ;;  %v3761_v48 = vld [vmem:[%s6033_s10 + $0x30] sm:$0xff] }
 0x8ec   : >> { %4436 = vmatpush3.msra.mxu1 %v3761_v48 }
 0x8ed   : >> { %v3583_v38 = vmul.f32 %v5841_v29, %v5841_v29  ;;  %v3602_v55 = vmul.f32 %v4883_v3, %v5841_v29  ;;  %4437 = vmatprep.subr.mxu1 %v4728_v52  ;;  %v3760_v29 = vld [vmem:[%s6033_s10 + $0x28] sm:$0xff] }
 0x8ee   : >> { %4438 = vmatpush3.msra.mxu1 %v3760_v29 }
 0x8ef   : >> { %v3590_v27 = vsel %vm598_vm3, %v3583_v38, 0.0  ;;  %v3759_v38 = vld [vmem:[%s6033_s10 + $0x20] sm:$0xff]  ;;  %4439 = vmatprep.subr.mxu1 %v4728_v52 }
 0x8f0   : >> { %3591 = vadd.xlane.f32.xlu1 %v3590_v27  ;;  %v3758_v27 = vld [vmem:[%s6033_s10 + $0x18] sm:$0xff]  ;;  %4440 = vmatpush3.msra.mxu1 %v3759_v38 }
 0x8f1   : >> { %4441 = vmatprep.subr.mxu1 %v4728_v52 }
 0x8f2   : >> { %4442 = vmatpush3.msra.mxu1 %v3758_v27 }
 0x8f3   : >> { %4443 = vmatprep.subr.mxu1 %v4728_v52 }
 0x8f4   : >> { %4444 = vmatpush3.msra.mxu1 %v3757_v59 }
 0x8f5   : >> { %4445 = vmatprep.subr.mxu1 %v4728_v52 }
 0x8f6   : >> { %4446 = vmatpush3.msra.mxu1 %v3756_v37 }
 0x8f7   : >> { %4447 = vmatprep.subr.mxu1 %v4728_v52 }
 0x8f8   : >> { %4448 = vmatpush3.msra.mxu1 %v3755_v2 }
 0x950   : >> { %v3586_v53 = vpop.xlane.xlu0 %3585 }
 0x951   : >> { %v3593_v61 = vmul.f32 0.032258064, %v3586_v53 }
 0x953   : >> { %4614 = vrsqrt.f32 %v3593_v61  ;;  %vm3605_vm14 = vcmp.eq.f32.partialorder %v3593_v61, inf  ;;  %v3608_v54 = vand.u32 2147483648, %v3593_v61  ;;  %vm3607_vm15 = vcmp.eq.f32.partialorder %v3593_v61, 0.0 }
 0x959   : >> { %v3589_v25 = vpop.xlane.xlu0 %3588 }
 0x95a   : >> { %v3594_v33 = vmul.f32 0.032258064, %v3589_v25 }
 0x95c   : >> { %4616 = vrsqrt.f32 %v3594_v33  ;;  %vm3612_vm0 = vcmp.eq.f32.partialorder %v3594_v33, inf  ;;  %v3615_v23 = vand.u32 2147483648, %v3594_v33  ;;  %vm3614_vm2 = vcmp.eq.f32.partialorder %v3594_v33, 0.0 }
 0x960   : >> { %v4615_v50 = vpop.eup %4614 }
 0x961   : >> { %v3604_v14 = vmul.f32 %v4615_v50, %v3593_v61 }
 0x963   : >> { %v3606_v63 = vsel %vm3605_vm14, %v3593_v61, %v3604_v14 }
 0x964   : >> { %v3609_v9 = vsel %vm3607_vm15, %v3608_v54, %v3606_v63 }
 0x965   : >> { %v3624_v17 = vadd.f32 1e-06, %v3609_v9 }
 0x967   : >> { %4618 = vrcp.f32 %v3624_v17 }
 0x969   : >> { %v4617_v62 = vpop.eup %4616 }
 0x96a   : >> { %v3611_v18 = vmul.f32 %v4617_v62, %v3594_v33 }
 0x96c   : >> { %v3613_v46 = vsel %vm3612_vm0, %v3594_v33, %v3611_v18 }
 0x96d   : >> { %v3616_v47 = vsel %vm3614_vm2, %v3615_v23, %v3613_v46 }
 0x96e   : >> { %v3625_v43 = vadd.f32 1e-06, %v3616_v47 }
 0x970   : >> { %4620 = vrcp.f32 %v3625_v43 }
 0x974   : >> { %v4619_v20 = vpop.eup %4618 }
 0x975   : >> { %v3628_v39 = vmul.f32 %v4619_v20, %v3600_v35 }
 0x977   : >> { %v3637_v49 = vadd.f32 %v4888_v4, %v3628_v39 }
 0x979   : >> { %v3592_v45 = vpop.xlane.xlu1 %3591  ;;  %4409 = vmatmul.mubr.msk.f32.vlgmr.msra.gmra.mxu0 %vm598_vm3, %v3637_v49 }
 0x97a   : >> { %v3595_v40 = vmul.f32 0.032258064, %v3592_v45  ;;  %4411 = vmatprep.mubr.msk.f32.mxu0 %vm4729_vm4, %v4728_v52  ;;  %v4125_v45 = vld [vmem:[%s6034_s11] ss:$0 sm:$0xff] }
 0x97c   : >> { %4622 = vrsqrt.f32 %v3595_v40  ;;  %vm3619_vm5 = vcmp.eq.f32.partialorder %v3595_v40, inf  ;;  %v3622_v41 = vand.u32 2147483648, %v3595_v40  ;;  %vm3621_vm6 = vcmp.eq.f32.partialorder %v3595_v40, 0.0 }
 0x97d   : >> { %v4621_v24 = vpop.eup %4620 }
 0x97e   : >> { %v3630_v51 = vmul.f32 %v4621_v24, %v3601_v44 }
 0x980   : >> { %v3638_v26 = vadd.f32 %v4888_v4, %v3630_v51 }
 0x982   : >> { %4412 = vmatmul.mubr.msk.f32.gmra.mxu0 %vm598_vm3, %v3638_v26 }
 0x983   : >> { %4414 = vmatprep.mubr.msk.f32.mxu0 %vm4729_vm4, %v4728_v52 }
 0x989   : >> { %v4623_v5 = vpop.eup %4622 }
 0x98a   : >> { %v3618_v16 = vmul.f32 %v4623_v5, %v3595_v40 }
 0x98c   : >> { %v3620_v57 = vsel %vm3619_vm5, %v3595_v40, %v3618_v16 }
 0x98d   : >> { %v3623_v36 = vsel %vm3621_vm6, %v3622_v41, %v3620_v57 }
 0x98e   : >> { %v3626_v13 = vadd.f32 1e-06, %v3623_v36 }
 0x990   : >> { %4624 = vrcp.f32 %v3626_v13 }
 0x99d   : >> { %v4625_v32 = vpop.eup %4624 }
 0x99e   : >> { %v3632_v12 = vmul.f32 %v4625_v32, %v3602_v55 }
 0x9a0   : >> { %v3639_v22 = vadd.f32 %v4888_v4, %v3632_v12  ;;  %v3881_v12 = vld [vmem:[%s6035_s12 + $0x18] sm:$0xff] (%p591_p11) }
 0x9a2   : >> { %4415 = vmatmul.mubr.msk.f32.gmra.mxu0 %vm598_vm3, %v3639_v22  ;;  %v4740_v22 = vmov (%p591_p11), 0.0  }
 0x9a3   : > { %4458 = vmatprep.subr.mxu0 (%p591_p11), %v4740_v22  ;;  %4466 = vmatprep.mubr.msk.f32.mxu0 (%p591_p11), %vm4741_vm7, %v4740_v22 }
 0x9a4   : > { %4459 = vmatpush3.msra.mxu0 (%p591_p11), %v3881_v12 }
 0x9a5   : > { %4460 = vmatprep.subr.mxu0 (%p591_p11), %v4740_v22 }
 0x9a6   : > { %4461 = vmatpush3.msra.mxu0 (%p591_p11), %v3880_v34 }
 0x9a7   : > { %4462 = vmatprep.subr.mxu0 (%p591_p11), %v4740_v22 }
 0x9a8   : > { %4463 = vmatpush3.msra.mxu0 (%p591_p11), %v3879_v0 }
 0x9a9   : > { %4464 = vmatprep.subr.mxu0 (%p591_p11), %v4740_v22 }
 0x9aa   : > { %4465 = vmatpush3.msra.mxu0 (%p591_p11), %v3878_v1 }
 0xa39   : >> { %v3726_v42 = vpop.f32.mrf.mxu0 }
 0xa3a   : >> { %v3727_v11 = vadd.f32 %v4121_v30, %v3726_v42 }
 0xa3b   : >> { %v4410_v8 = vpop.f32.mrf.mxu0 }
 0xa3c   : >> { %v3743_v58 = vmul.f32 0.70710677, %v3727_v11  ;;  %v3740_v14 = vmul.f32 0.5, %v3727_v11 }
 0xa3e   : >> { %4626 = verf.f32 %v3743_v58 }
 0xa42   : >> { %v3731_v53 = vpop.f32.mrf.mxu0 }
 0xa43   : >> { %v3732_v61 = vadd.f32 %v4121_v30, %v3731_v53 }
 0xa44   : >> { %v4413_v25 = vpop.f32.mrf.mxu0 }
 0xa45   : >> { %v3744_v33 = vmul.f32 0.70710677, %v3732_v61  ;;  %v3741_v17 = vmul.f32 0.5, %v3732_v61 }
 0xa47   : >> { %4628 = verf.f32 %v3744_v33 }
 0xa4b   : >> { %v4627_v50 = vpop.eup %4626 }
 0xa4c   : >> { %v3749_v54 = vadd.f32 1.0, %v4627_v50 }
 0xa4e   : >> { %v3752_v63 = vmul.f32 %v3749_v54, %v3740_v14 }
 0xa50   : >> { %4450 = vmatmul.mubr.f32.vlgmr.msra.gmra.mxu1 %v3752_v63 }
 0xa51   : >> { %4452 = vmatprep.mubr.msk.f32.mxu1 %vm4729_vm4, %v4728_v52 }
 0xa54   : >> { %v4629_v9 = vpop.eup %4628 }
 0xa55   : >> { %v3750_v62 = vadd.f32 1.0, %v4629_v9 }
 0xa57   : >> { %v3753_v18 = vmul.f32 %v3750_v62, %v3741_v17 }
 0xa59   : >> { %4453 = vmatmul.mubr.f32.gmra.mxu1 %v3753_v18 }
 0xa5a   : >> { %4455 = vmatprep.mubr.msk.f32.mxu1 %vm4729_vm4, %v4728_v52  ;;  %vm3861_vm4 = vcmask (%p591_p11), 253952  }
 0xa62   : >> { %v3736_v23 = vpop.f32.mrf.mxu0 }
 0xa63   : >> { %v3737_v46 = vadd.f32 %v4121_v30, %v3736_v23 }
 0xa64   : >> { %v4416_v47 = vpop.f32.mrf.mxu0 }
 0xa65   : >> { %v3745_v43 = vmul.f32 0.70710677, %v3737_v46  ;;  %v3742_v20 = vmul.f32 0.5, %v3737_v46 }
 0xa67   : >> { %4630 = verf.f32 %v3745_v43 }
 0xa74   : >> { %v4631_v35 = vpop.eup %4630 }
 0xa75   : >> { %v3751_v39 = vadd.f32 1.0, %v4631_v35 }
 0xa77   : >> { %v3754_v49 = vmul.f32 %v3751_v39, %v3742_v20 }
 0xa79   : >> { %4456 = vmatmul.mubr.f32.gmra.mxu1 %v3754_v49 }
 0xb10   : >> { %v3844_v40 = vpop.f32.mrf.mxu1 }
 0xb11   : >> { %v3845_v44 = vadd.f32 %v4125_v45, %v3844_v40 }
 0xb12   : >> { %v4451_v24 = vpop.f32.mrf.mxu1 }
 0xb13   : >> { %v3858_v51 = vadd.f32 %v3845_v44, %v5814_v60  }
 0xb15   : > { %v3862_v60 = vsel (%p591_p11), %vm3861_vm4, %v3858_v51, 0.0 }
 0xb16   : > { %3863 = vadd.xlane.f32.xlu0 (%p591_p11), %v3862_v60 }
 0xb19   : >> { %v3849_v52 = vpop.f32.mrf.mxu1 }
 0xb1a   : >> { %v3850_v26 = vadd.f32 %v4125_v45, %v3849_v52 }
 0xb1b   : >> { %v4454_v5 = vpop.f32.mrf.mxu1 }
 0xb1c   : >> { %v3859_v32 = vadd.f32 %v3850_v26, %v5819_v56  }
 0xb38   : > { %593 = sbr.rel (!%p591_p11) target bundleno = 237 (0xed), region = 118 }
 0xb39   : >> { %v3854_v16 = vpop.f32.mrf.mxu1 }
 0xb3a   : >> { %v3855_v41 = vadd.f32 %v4125_v45, %v3854_v16 }
 0xb3b   : >> { %v4457_v57 = vpop.f32.mrf.mxu1 }
 0xb3c   : >> { %v3860_v28 = vadd.f32 %v3855_v41, %v5824_v31   ;;  %v6051_v31 = vmov %v3858_v51 }
 0xb9f   : > { %v3864_v56 = vpop.xlane.xlu0 %3863 }
 0xba0   : > { %v3866_v36 = vmul.f32 0.03125, %v3864_v56 }
 0xba2   : > { %v3867_v13 = vsub.f32 %v3858_v51, %v3866_v36 }
 0xba4   : > { %v3868_v55 = vmul.f32 %v3867_v13, %v3867_v13 }
 0xba6   : > { %v3869_v31 = vsel %vm3861_vm4, %v3868_v55, 0.0 }
 0xba7   : > { %3870 = vadd.xlane.f32.xlu0 %v3869_v31 }
 0xc30   : > { %v3871_v3 = vpop.xlane.xlu0 %3870 }
 0xc31   : > { %v3872_v4 = vmul.f32 0.03125, %v3871_v3 }
 0xc33   : > { %v3873_v15 = vadd.f32 1e-05, %v3872_v4 }
 0xc35   : > { %4632 = vrsqrt.f32 %v3873_v15 }
 0xc42   : > { %v4633_v32 = vpop.eup %4632 }
 0xc43   : > { %v3875_v28 = vmul.f32 %v4633_v32, %v3867_v13 }
 0xc45   : > { %v3876_v21 = vmul.f32 %v3875_v28, %v4896_v6 }
 0xc47   : > { %v3877_v19 = vadd.f32 %v3876_v21, %v4901_v7 }
 0xc49   : > { %4467 = vmatmul.mubr.msk.f32.vlgmr.msra.gmra.mxu0 %vm598_vm3, %v3877_v19 }
 0xd09   : > { %v3953_v48 = vpop.f32.mrf.mxu0 }
 0xd0a   : > { %v3954_v29 = vadd.f32 %v3953_v48, %v3882_v10 }
 0xd0b   : > { %v4468_v38 = vpop.f32.mrf.mxu0 }
 0xd0c   : > { %3957 = vst [vmem:[%s4940_s26] sm:$0x1] %v3954_v29 }
 0xd0d   : > { %4647 = shalt.err (!%p4644_p4)
}
 0xd0e   : > { %s4648_s26 = scalar_lea.hbm %s5985_s15, 16  ;;  %s4652_s27 = scalar_lea.hbm %s6037_s14, 32 }
 0xd0f   : > { %p4649_p7 = scmp.ne.s32.totalorder %s5985_s15, %s4648_s26  ;;  %p4653_p10 = scmp.lt.s32.totalorder %s5985_s15, %s6037_s14 }
 0xd10   : > { %p4654_p11 = scmp.lt.s32.totalorder %s4652_s27, %s4648_s26 }
 0xd11   : > { %p4650_p8 = pnand %p4649_p7, %p4856_p5 }
 0xd12   : > { %p4655_p12 = por %p4654_p11, %p4653_p10 }
 0xd13   : > { %p4651_p9 = pneg %p4650_p8 }
 0xd15   : > { %p4656_p13 = pnand %p4655_p12, %p4651_p9 }
 0xd17   : > { %4659 = shalt.err (!%p4656_p13)
}
 0xd18   : > { %4469 = dma.vmem_to_hbm [thread:$0]  (%p4856_p5), %s3972_s20, 16, %s5985_s15, %s3959_s25  }
 0xd19 PF: > { %p4475_p0 = scmp.ge.s32.totalorder %s4710_s16, 2  ;;  %s3983_s0 = sand.u32 1, %s4698_s29  }
 0xd1a   : > { %s3984_s17 = scalar_lea.sflag [#allocation3], %s3983_s0 }
 0xd1b   : > { %p4472_p1 = pnand %p4475_p0, %p4860_p6 }
 0xd1d   : > { %p4473_p2 = pneg %p4472_p1 }
 0xd1f   : > { %4693 = dma.done.wait (%p4473_p2), %s3984_s17, 16  }
 0xd20   : > { %4695 = vsyncadd (%p4473_p2), %s3984_s17, 4294967280  ;;  %s6053_s16 = sld [smem:[#allocation6_spill]]  ;;  %s6056_s29 = smov %s4702_s30 }
 0xd21   : > { %s6054_s28 = sld [smem:[#allocation5_spill]] }
 0xd22   : > { %s6055_s15 = sld [smem:[#allocation7_spill]] }
 0xd26   : > { %p24_p3 = scmp.ge.s32.totalorder %s6053_s16, 4  }
 0xd27   : > { %s6057_s30 = smov %s6054_s28 }
 0xd28   :  { %26 = sbr.rel (!%p24_p3) target bundleno = 5 (0x5), region = 129 }
 0xd2d   :  { %3988 = vsyncpa [#allocation3], 1 }
 0xd2e   :  { %3990 = vsyncpa [#allocation3 + $0x1], 1 }

</bundles_post_ra>
